<compile_context>
chip_gen: v6e
topology: v6e:2x2x1
jax: 0.10.0
libtpu: 0.0.40
codegen_flags: <defaults>
</compile_context>

<pallas_src>
import jax
import jax.numpy as jnp
from jax.experimental import pallas as pl
from jax.experimental.pallas import tpu as pltpu


def _round_up(x, m):
    return (x + m - 1) // m * m


def _row_multiple(dtype):
    """Sublane packing multiple: 8 for 32-bit, 16 for 16-bit, 32 for 8-bit."""
    bits = jnp.dtype(dtype).itemsize * 8
    return max(8, 256 // bits)


def _vmem_capacity_bytes():
    """Physical VMEM per core; conservative (v7x) fallback if query fails."""
    try:
        return int(pltpu.get_tpu_info().vmem_capacity_bytes)
    except Exception:
        return 64 * 1024 * 1024


def _mlp_kernel(x_ref, w1_ref, w2_ref, o_ref):
    # fc1 + ReLU, f32 accumulation on the MXU.
    h = jnp.dot(x_ref[...], w1_ref[...], preferred_element_type=jnp.float32)
    h = jnp.maximum(h, 0.0)
    # fc2. Cast keeps the second matmul a bf16 MXU pass for bf16 models
    # (no-op for f32).
    y = jnp.dot(h.astype(x_ref.dtype), w2_ref[...],
                preferred_element_type=jnp.float32)
    o_ref[...] = y.astype(o_ref.dtype)


def prepare_weights(w1, w2):
    """Transpose PyTorch nn.Linear-layout weights once (call at init time).

    w1: [d_hid, d_in], w2: [d_out, d_hid]
    returns (w1_t [d_in, d_hid], w2_t [d_hid, d_out])
    """
    return jnp.asarray(w1).T.copy(), jnp.asarray(w2).T.copy()


def _choose_tile_n(n, d_in, d_hid, d_out, itemsize, row_mult, cap, budget):
    """Largest row tile (multiple of row_mult, <= cap) fitting the VMEM budget.

    Ensures at least 2 row tiles when N allows so the "parallel" grid axis can
    feed both v7x TensorCores.
    """
    if n <= row_mult:
        return n  # single full-extent block (always layout-legal)

    tile = min(cap, _round_up(n, row_mult))
    if n >= 2 * row_mult:
        # Cap so the grid has >= 2 steps (megacore sharding on v7x).
        tile = min(tile, _round_up((n + 1) // 2, row_mult))
    tile = _round_up(tile, row_mult)

    def working_set(t):
        return (
            2 * t * d_in * itemsize                              # x tiles (double-buffered)
            + 2 * t * d_out * itemsize                           # out tiles (double-buffered)
            + 2 * (d_in * d_hid + d_hid * d_out) * itemsize      # resident weights (2 bufs)
            + t * d_hid * 4 + t * d_out * 4                      # f32 intermediates
        )

    while tile > row_mult and working_set(tile) > budget:
        tile = _round_up(max(tile // 2, row_mult), row_mult)

    if tile >= n:
        return n  # full-extent single block
    return tile


def mlp_forward_prepared(x, w1_t, w2_t):
    """x: [N, d_in]; w1_t: [d_in, d_hid]; w2_t: [d_hid, d_out] (pre-transposed)."""
    n, d_in = x.shape
    d_in_w, d_hid = w1_t.shape
    d_hid2, d_out = w2_t.shape
    assert d_in == d_in_w and d_hid == d_hid2

    itemsize = jnp.dtype(x.dtype).itemsize
    row_mult = _row_multiple(x.dtype)
    capacity = _vmem_capacity_bytes()
    # Bigger tiles on 128-MiB-VMEM parts (v5e/v6e); 512 cap sized for v7x.
    row_cap = 2048 if capacity >= 128 * 1024 * 1024 else 512
    scoped = capacity // 2                      # explicit scoped-VMEM limit
    budget = scoped - (2 << 20)                 # headroom for internal scratch

    tile_n = _choose_tile_n(n, d_in, d_hid, d_out, itemsize, row_mult,
                            row_cap, budget)
    grid_n = pl.cdiv(n, tile_n)

    out = pl.pallas_call(
        _mlp_kernel,
        out_shape=jax.ShapeDtypeStruct((n, d_out), x.dtype),
        grid_spec=pltpu.PrefetchScalarGridSpec(
            num_scalar_prefetch=0,
            grid=(grid_n,),
            in_specs=[
                pl.BlockSpec((tile_n, d_in), lambda i: (i, 0)),
                pl.BlockSpec((d_in, d_hid), lambda i: (0, 0)),   # VMEM-resident
                pl.BlockSpec((d_hid, d_out), lambda i: (0, 0)),  # VMEM-resident
            ],
            out_specs=pl.BlockSpec((tile_n, d_out), lambda i: (i, 0)),
        ),
        compiler_params=pltpu.CompilerParams(
            # Row tiles are independent -> megacore-shard on v7x's 2 TCs.
            dimension_semantics=("parallel",),
            vmem_limit_bytes=int(scoped),
        ),
    )(x, w1_t, w2_t)
    return out


def mlp_forward(x, w1, w2):
    """Convenience wrapper taking PyTorch nn.Linear-layout weights.

    For repeated calls, run prepare_weights() once and call
    mlp_forward_prepared() to keep the transpose off the hot path.
    """
    w1_t, w2_t = prepare_weights(w1, w2)
    return mlp_forward_prepared(x, w1_t, w2_t)


if __name__ == "__main__":
    # Batched node-feature matrix (GIN MLPs see stacked node features).
    # N deliberately not a multiple of the tile to exercise the ragged tail.
    N, INPUT_DIM, HIDDEN_DIM, OUTPUT_DIM = 1000, 32, 64, 16

    key = jax.random.PRNGKey(0)
    kx, k1, k2 = jax.random.split(key, 3)

    x = jax.random.normal(kx, (N, INPUT_DIM), dtype=jnp.float32)
    # Deterministic init mimicking nn.Linear's uniform(-1/sqrt(fan_in), +1/sqrt(fan_in)).
    b1 = 1.0 / jnp.sqrt(INPUT_DIM)
    b2 = 1.0 / jnp.sqrt(HIDDEN_DIM)
    w1 = jax.random.uniform(k1, (HIDDEN_DIM, INPUT_DIM), jnp.float32, -b1, b1)
    w2 = jax.random.uniform(k2, (OUTPUT_DIM, HIDDEN_DIM), jnp.float32, -b2, b2)

    # One-time weight prep (transpose), then the row-tiled kernel.
    w1_t, w2_t = prepare_weights(w1, w2)
    out = mlp_forward_prepared(x, w1_t, w2_t)
    out = jax.block_until_ready(out)

    # Pure-JAX reference check.
    ref = jnp.maximum(x @ w1.T, 0.0) @ w2.T
    assert out.shape == (N, OUTPUT_DIM)
    assert jnp.allclose(out, ref, atol=1e-4, rtol=1e-4), float(
        jnp.max(jnp.abs(out - ref)))

    print("KERNEL_OK")
</pallas_src>

<mosaic_0001>
module attributes {stable_mosaic.version = 11 : i64} {
  func.func @_mlp_kernel(%arg0: i32, %arg1: memref<504x32xf32, #tpu.memory_space<vmem>>, %arg2: memref<32x64xf32, #tpu.memory_space<vmem>>, %arg3: memref<64x16xf32, #tpu.memory_space<vmem>>, %arg4: memref<504x16xf32, #tpu.memory_space<vmem>>) attributes {dimension_semantics = [#tpu.dimension_semantics<parallel>], iteration_bounds = array<i64: 2>, scalar_prefetch = 0 : i64, scratch_operands = 0 : i64, tpu.core_type = #tpu.core_type<tc>, window_params = [{transform_indices = @transform_0, window_bounds = array<i64: 504, 32>}, {pipeline_mode = #tpu.pipeline_mode<synchronous>, transform_indices = @transform_1, window_bounds = array<i64: 32, 64>}, {pipeline_mode = #tpu.pipeline_mode<synchronous>, transform_indices = @transform_2, window_bounds = array<i64: 64, 16>}, {transform_indices = @transform_3, window_bounds = array<i64: 504, 16>}]} {
    %c0 = arith.constant 0 : index
    %c0_0 = arith.constant 0 : index
    %0 = vector.load %arg1[%c0, %c0_0] : memref<504x32xf32, #tpu.memory_space<vmem>>, vector<504x32xf32>
    %c0_1 = arith.constant 0 : index
    %c0_2 = arith.constant 0 : index
    %1 = vector.load %arg2[%c0_1, %c0_2] : memref<32x64xf32, #tpu.memory_space<vmem>>, vector<32x64xf32>
    %cst = arith.constant dense<0.000000e+00> : vector<504x64xf32>
    %2 = tpu.matmul %0, %1, %cst {dimension_numbers = #tpu.dot_dimension_numbers<[1], [0], [0], [1], [0, 0, 1, 1], [], []>} : vector<504x32xf32>, vector<32x64xf32>, vector<504x64xf32> -> vector<504x64xf32>
    %cst_3 = arith.constant 0.000000e+00 : f32
    %3 = vector.broadcast %cst_3 : f32 to vector<504x64xf32>
    %4 = arith.maximumf %2, %3 : vector<504x64xf32>
    %c0_4 = arith.constant 0 : index
    %c0_5 = arith.constant 0 : index
    %5 = vector.load %arg3[%c0_4, %c0_5] : memref<64x16xf32, #tpu.memory_space<vmem>>, vector<64x16xf32>
    %cst_6 = arith.constant dense<0.000000e+00> : vector<504x16xf32>
    %6 = tpu.matmul %4, %5, %cst_6 {dimension_numbers = #tpu.dot_dimension_numbers<[1], [0], [0], [1], [0, 0, 1, 1], [], []>} : vector<504x64xf32>, vector<64x16xf32>, vector<504x16xf32> -> vector<504x16xf32>
    %c0_7 = arith.constant 0 : index
    %c0_8 = arith.constant 0 : index
    %7 = vector.load %arg4[%c0_7, %c0_8] : memref<504x16xf32, #tpu.memory_space<vmem>>, vector<504x16xf32>
    tpu.vector_store %arg4[%c0_7, %c0_8], %6 {strides = array<i32>} : memref<504x16xf32, #tpu.memory_space<vmem>>, vector<504x16xf32>,
    return
  }
  func.func @transform_0(%arg0: i32) -> (i32, i32) {
    %c0_i32 = arith.constant 0 : i32
    %c0_i32_0 = arith.constant 0 : i32
    return %arg0, %c0_i32 : i32, i32
  }
  func.func @transform_1(%arg0: i32) -> (i32, i32) {
    %c0_i32 = arith.constant 0 : i32
    %c0_i32_0 = arith.constant 0 : i32
    %c0_i32_1 = arith.constant 0 : i32
    return %c0_i32, %c0_i32_0 : i32, i32
  }
  func.func @transform_2(%arg0: i32) -> (i32, i32) {
    %c0_i32 = arith.constant 0 : i32
    %c0_i32_0 = arith.constant 0 : i32
    %c0_i32_1 = arith.constant 0 : i32
    return %c0_i32, %c0_i32_0 : i32, i32
  }
  func.func @transform_3(%arg0: i32) -> (i32, i32) {
    %c0_i32 = arith.constant 0 : i32
    %c0_i32_0 = arith.constant 0 : i32
    return %arg0, %c0_i32 : i32, i32
  }
}

</mosaic_0001>

<bundles_post_ra>
// kernel: tpu_custom_call.1
= control target key start
LH: loop header
LB: loop body
LE: loop exit
PB: predicated region body
PF: predicated region fallthrough
CT: control target
= control target key end

     0   :  { %s2906_s12 = smov 0   ;;  %s2908_s13 = smov 0   ;;  %s3773_s0 = inlined_call_operand.vmem [shape: f32[1000,32], index: 0, kind: input, shape index: {}]   ;;  %s3774_s1 = inlined_call_operand.vmem [shape: f32[32,64], index: 1, kind: input, shape index: {}]   ;;  %s3775_s2 = inlined_call_operand.vmem [shape: f32[64,16], index: 2, kind: input, shape index: {}]   ;;  %s3776_s3 = inlined_call_operand.vmem [shape: f32[1000,16], index: 3, kind: output, shape index: {}]  }
   0x1   :  { %s2910_s14 = smov 0  }
   0x2 LB: > { %s2919_s15 = sadd.s32 4294967295, %s2850_s14   ;;  %s2921_s16 = sadd.s32 1, %s2850_s14   ;;  %s2850_s14 = sphi %s2910_s14, %s3785_s14   ;;  %s2846_s13 = sphi %s2908_s13, %s3784_s13   ;;  %s2842_s12 = sphi %s2906_s12, %s3783_s12  }
   0x3   : > { %s85_s17 = ssub.s32 %s2850_s14, %s2921_s16  ;;  %s88_s18 = sadd.s32 1, %s2846_s13 }
   0x4   : > { %p86_p0 = scmp.eq.s32.totalorder %s85_s17, 0  ;;  %p98_p1 = scmp.ne.s32.totalorder %s2846_s13, %s2842_s12 }
   0x5   : > { %p99_p2 = scmp.eq.s32.totalorder %s2919_s15, 1  ;;  %p2003_p3 = scmp.ge.s32.totalorder %s2850_s14, 1 }
   0x6   : > { %s2929_s19 = scalar_select %p86_p0, %s2846_s13, %s88_s18  }
   0x7   : > { %p2931_p4 = por %p99_p2, %p98_p1  ;;  %p146_p5 = scmp.lt.s32.totalorder %s2850_s14, 3 }
   0x9   : > { %p147_p6 = pnand %p2003_p3, %p146_p5 }
   0xa   : > { %s2939_s23 = smul.u32 (!%p147_p6), 63, %s2919_s15 }
   0xb   : > { %150 = sbr.rel (%p147_p6) target bundleno = 741 (0x2e5), region = 32 }
   0xc   : > { %p178_p7 = scmp.lt.s32.totalorder (!%p147_p6), %s2939_s23, 124 }
  0x10   : > { %v258_v0 = vld [vmem:[%s3774_s1 + $0x18] sm:$0xff]  ;;  %v2884_v1 = vmov 0.0   ;;  %v257_v2 = vld [vmem:[%s3774_s1 + $0x10] sm:$0xff]  ;;  %vm2885_vm0 = vmmov 0   ;;  %v256_v3 = vld [vmem:[%s3774_s1 + $0x8] sm:$0xff]  ;;  %s179_s28 = scalar_select %p178_p7, %s2939_s23, 124 }
  0x11   : > { %2282 = vmatprep.subr.mxu0 %v2884_v1  ;;  %2290 = vmatprep.mubr.msk.f32.mxu0 %vm2885_vm0, %v2884_v1  ;;  %v255_v4 = vld [vmem:[%s3774_s1] sm:$0xff]  ;;  %vm259_vm1 = vcmask 261120   ;;  %v899_v20 = vld [vmem:[%s3775_s2 + $0x38] sm:$0xff]  ;;  %v898_v21 = vld [vmem:[%s3775_s2 + $0x30] sm:$0xff]  ;;  %vm900_vm2 = vcmask 523264   ;;  %vm1470_vm3 = vcmask 130048  }
  0x12   : > { %2283 = vmatpush3.msra.mxu0 %v258_v0  ;;  %2684 = vmatprep.subr.mxu1 %v2884_v1  ;;  %s2004_s4 = sshll.u32 %s179_s28, 3  ;;  %v897_v23 = vld [vmem:[%s3775_s2 + $0x28] sm:$0xff]  ;;  %v896_v24 = vld [vmem:[%s3775_s2 + $0x20] sm:$0xff]  ;;  %v895_v26 = vld [vmem:[%s3775_s2 + $0x18] sm:$0xff]  ;;  %s1542_s6 = ssub.s32 (%p2931_p4), 125, %s2939_s23 }
  0x13   : > { %2284 = vmatprep.subr.mxu0 %v2884_v1  ;;  %2498 = vmatprep.mubr.msk.f32.mxu1 %vm2885_vm0, %v2884_v1  ;;  %s2964_s7 = scalar_lea.vmem %s3773_s0, %s2004_s4  ;;  %v894_v28 = vld [vmem:[%s3775_s2 + $0x10] sm:$0xff]  ;;  %v893_v29 = vld [vmem:[%s3775_s2 + $0x8] sm:$0xff]  ;;  %v892_v31 = vld [vmem:[%s3775_s2] sm:$0xff]  ;;  %s170_s4 = sand.u32 1, %s2842_s12  }
  0x14   : > { %2285 = vmatpush3.msra.mxu0 %v257_v2  ;;  %v192_v5 = vld [vmem:[%s2964_s7] sm:$0xff]  ;;  %v193_v6 = vld [vmem:[%s2964_s7 + $0x8] sm:$0xff]  ;;  %v194_v7 = vld [vmem:[%s2964_s7 + $0x10] sm:$0xff]  ;;  %2692 = vmatpush3.msra.mxu1 %v899_v20  ;;  %s2700_s5 = smul.u32 504, %s170_s4  ;;  %p1543_p8 = scmp.lt.s32.totalorder (%p2931_p4), %s1542_s6, 63 }
  0x15   : > { %2286 = vmatprep.subr.mxu0 %v2884_v1  ;;  %v195_v8 = vld [vmem:[%s2964_s7 + $0x18] sm:$0xff]  ;;  %v196_v9 = vld [vmem:[%s2964_s7 + $0x20] sm:$0xff]  ;;  %v197_v10 = vld [vmem:[%s2964_s7 + $0x28] sm:$0xff]  ;;  %2685 = vmatprep.subr.mxu1 %v2884_v1 }
  0x16   : > { %2287 = vmatpush3.msra.mxu0 %v256_v3  ;;  %v198_v11 = vld [vmem:[%s2964_s7 + $0x30] sm:$0xff]  ;;  %v199_v12 = vld [vmem:[%s2964_s7 + $0x38] sm:$0xff]  ;;  %v200_v13 = vld [vmem:[%s2964_s7 + $0x40] sm:$0xff]  ;;  %2693 = vmatpush3.msra.mxu1 %v898_v21  ;;  %s3407_s12 = scalar_lea.vmem [#allocation2], %s2700_s5  }
  0x17   : > { %2288 = vmatprep.subr.mxu0 %v2884_v1  ;;  %v201_v14 = vld [vmem:[%s2964_s7 + $0x48] sm:$0xff]  ;;  %v202_v15 = vld [vmem:[%s2964_s7 + $0x50] sm:$0xff]  ;;  %v203_v16 = vld [vmem:[%s2964_s7 + $0x58] sm:$0xff]  ;;  %2686 = vmatprep.subr.mxu1 %v2884_v1 }
  0x18   : > { %2289 = vmatpush3.msra.mxu0 %v255_v4  ;;  %v204_v17 = vld [vmem:[%s2964_s7 + $0x60] sm:$0xff]  ;;  %v205_v18 = vld [vmem:[%s2964_s7 + $0x68] sm:$0xff]  ;;  %v206_v19 = vld [vmem:[%s2964_s7 + $0x70] sm:$0xff]  ;;  %2694 = vmatpush3.msra.mxu1 %v897_v23 }
  0x19   : > { %2291 = vmatmul.mubr.msk.f32.vlgmr.msra.gmra.mxu0 %vm259_vm1, %v192_v5  ;;  %2479 = vmatprep.subr.mxu0 %v2884_v1  ;;  %v207_v22 = vld [vmem:[%s2964_s7 + $0x78] sm:$0xff]  ;;  %v208_v25 = vld [vmem:[%s2964_s7 + $0x80] sm:$0xff]  ;;  %v209_v27 = vld [vmem:[%s2964_s7 + $0x88] sm:$0xff] }
  0x1a   : > { %2293 = vmatprep.mubr.msk.f32.mxu0 %vm2885_vm0, %v2884_v1  ;;  %2480 = vmatpush3.msra.mxu0 %v899_v20  ;;  %v210_v30 = vld [vmem:[%s2964_s7 + $0x90] sm:$0xff]  ;;  %v211_v32 = vld [vmem:[%s2964_s7 + $0x98] sm:$0xff]  ;;  %v212_v33 = vld [vmem:[%s2964_s7 + $0xa0] sm:$0xff] }
  0x1b   : > { %2481 = vmatprep.subr.mxu0 %v2884_v1  ;;  %2687 = vmatprep.subr.mxu1 %v2884_v1  ;;  %v213_v34 = vld [vmem:[%s2964_s7 + $0xa8] sm:$0xff]  ;;  %v214_v35 = vld [vmem:[%s2964_s7 + $0xb0] sm:$0xff]  ;;  %v215_v36 = vld [vmem:[%s2964_s7 + $0xb8] sm:$0xff] }
  0x1c   : > { %2695 = vmatpush3.msra.mxu1 %v896_v24  ;;  %2482 = vmatpush3.msra.mxu0 %v898_v21  ;;  %v216_v37 = vld [vmem:[%s2964_s7 + $0xc0] sm:$0xff]  ;;  %v217_v38 = vld [vmem:[%s2964_s7 + $0xc8] sm:$0xff]  ;;  %v218_v39 = vld [vmem:[%s2964_s7 + $0xd0] sm:$0xff] }
  0x1d   : > { %2294 = vmatmul.mubr.msk.f32.gmra.mxu0 %vm259_vm1, %v193_v6  ;;  %2688 = vmatprep.subr.mxu1 %v2884_v1  ;;  %v219_v40 = vld [vmem:[%s2964_s7 + $0xd8] sm:$0xff]  ;;  %v220_v41 = vld [vmem:[%s2964_s7 + $0xe0] sm:$0xff]  ;;  %v221_v42 = vld [vmem:[%s2964_s7 + $0xe8] sm:$0xff] }
  0x1e   : > { %2296 = vmatprep.mubr.msk.f32.mxu0 %vm2885_vm0, %v2884_v1  ;;  %2483 = vmatprep.subr.mxu0 %v2884_v1  ;;  %v222_v43 = vld [vmem:[%s2964_s7 + $0xf0] sm:$0xff]  ;;  %v223_v44 = vld [vmem:[%s2964_s7 + $0xf8] sm:$0xff]  ;;  %v224_v45 = vld [vmem:[%s2964_s7 + $0x100] sm:$0xff] }
  0x1f   : > { %2696 = vmatpush3.msra.mxu1 %v895_v26  ;;  %2484 = vmatpush3.msra.mxu0 %v897_v23  ;;  %v225_v46 = vld [vmem:[%s2964_s7 + $0x108] sm:$0xff]  ;;  %v226_v47 = vld [vmem:[%s2964_s7 + $0x110] sm:$0xff]  ;;  %v227_v48 = vld [vmem:[%s2964_s7 + $0x118] sm:$0xff] }
  0x20   : > { %2689 = vmatprep.subr.mxu1 %v2884_v1  ;;  %2485 = vmatprep.subr.mxu0 %v2884_v1  ;;  %v228_v49 = vld [vmem:[%s2964_s7 + $0x120] sm:$0xff]  ;;  %v229_v50 = vld [vmem:[%s2964_s7 + $0x128] sm:$0xff]  ;;  %v230_v51 = vld [vmem:[%s2964_s7 + $0x130] sm:$0xff] }
  0x21   : > { %2297 = vmatmul.mubr.msk.f32.gmra.mxu0 %vm259_vm1, %v194_v7  ;;  %2697 = vmatpush3.msra.mxu1 %v894_v28  ;;  %v231_v52 = vld [vmem:[%s2964_s7 + $0x138] sm:$0xff]  ;;  %v232_v53 = vld [vmem:[%s2964_s7 + $0x140] sm:$0xff]  ;;  %v233_v54 = vld [vmem:[%s2964_s7 + $0x148] sm:$0xff] }
  0x22   : > { %2299 = vmatprep.mubr.msk.f32.mxu0 %vm2885_vm0, %v2884_v1  ;;  %2690 = vmatprep.subr.mxu1 %v2884_v1  ;;  %v234_v55 = vld [vmem:[%s2964_s7 + $0x150] sm:$0xff]  ;;  %v235_v56 = vld [vmem:[%s2964_s7 + $0x158] sm:$0xff]  ;;  %v236_v57 = vld [vmem:[%s2964_s7 + $0x160] sm:$0xff] }
  0x23   : > { %2698 = vmatpush3.msra.mxu1 %v893_v29  ;;  %2486 = vmatpush3.msra.mxu0 %v896_v24  ;;  %v237_v58 = vld [vmem:[%s2964_s7 + $0x168] sm:$0xff]  ;;  %v238_v59 = vld [vmem:[%s2964_s7 + $0x170] sm:$0xff]  ;;  %v239_v60 = vld [vmem:[%s2964_s7 + $0x178] sm:$0xff] }
  0x24   : > { %2691 = vmatprep.subr.mxu1 %v2884_v1  ;;  %2487 = vmatprep.subr.mxu0 %v2884_v1  ;;  %v240_v61 = vld [vmem:[%s2964_s7 + $0x180] sm:$0xff]  ;;  %v241_v63 = vld [vmem:[%s2964_s7 + $0x188] sm:$0xff]  ;;  %v242_v4 = vld [vmem:[%s2964_s7 + $0x190] sm:$0xff] }
  0x25   : > { %2300 = vmatmul.mubr.msk.f32.gmra.mxu0 %vm259_vm1, %v195_v8  ;;  %2699 = vmatpush3.msra.mxu1 %v892_v31  ;;  %v243_v8 = vld [vmem:[%s2964_s7 + $0x198] sm:$0xff]  ;;  %v246_v20 = vld [vmem:[%s2964_s7 + $0x1b0] sm:$0xff] }
  0x26   : > { %2302 = vmatprep.mubr.msk.f32.mxu0 %vm2885_vm0, %v2884_v1  ;;  %2488 = vmatpush3.msra.mxu0 %v895_v26  ;;  %v247_v24 = vld [vmem:[%s2964_s7 + $0x1b8] sm:$0xff] }
  0x27   : > { %2489 = vmatprep.subr.mxu0 %v2884_v1 }
  0x28   : > { %2490 = vmatpush3.msra.mxu0 %v894_v28  ;;  %v248_v28 = vld [vmem:[%s2964_s7 + $0x1c0] sm:$0xff] }
  0x29   : > { %2303 = vmatmul.mubr.msk.f32.gmra.mxu0 %vm259_vm1, %v196_v9  ;;  %2491 = vmatprep.subr.mxu0 %v2884_v1 }
  0x2a   : > { %2305 = vmatprep.mubr.msk.f32.mxu0 %vm2885_vm0, %v2884_v1  ;;  %2492 = vmatpush3.msra.mxu0 %v893_v29 }
  0x2b   : > { %2493 = vmatprep.subr.mxu0 %v2884_v1 }
  0x2c   : > { %2494 = vmatpush3.msra.mxu0 %v892_v31 }
  0x2d   : > { %2306 = vmatmul.mubr.msk.f32.gmra.mxu0 %vm259_vm1, %v197_v10 }
  0x2e   : > { %2308 = vmatprep.mubr.msk.f32.mxu0 %vm2885_vm0, %v2884_v1 }
  0x31   : > { %2309 = vmatmul.mubr.msk.f32.gmra.mxu0 %vm259_vm1, %v198_v11 }
  0x32   : > { %2311 = vmatprep.mubr.msk.f32.mxu0 %vm2885_vm0, %v2884_v1 }
  0x35   : > { %2312 = vmatmul.mubr.msk.f32.gmra.mxu0 %vm259_vm1, %v199_v12  ;;  %v244_v12 = vld [vmem:[%s2964_s7 + $0x1a0] sm:$0xff] }
  0x36   : > { %2314 = vmatprep.mubr.msk.f32.mxu0 %vm2885_vm0, %v2884_v1 }
  0x39   : > { %2315 = vmatmul.mubr.msk.f32.gmra.mxu0 %vm259_vm1, %v200_v13 }
  0x3a   : > { %2317 = vmatprep.mubr.msk.f32.mxu0 %vm2885_vm0, %v2884_v1 }
  0x3d   : > { %2318 = vmatmul.mubr.msk.f32.gmra.mxu0 %vm259_vm1, %v201_v14 }
  0x3e   : > { %2320 = vmatprep.mubr.msk.f32.mxu0 %vm2885_vm0, %v2884_v1 }
  0x41   : > { %2321 = vmatmul.mubr.msk.f32.gmra.mxu0 %vm259_vm1, %v202_v15 }
  0x42   : > { %2323 = vmatprep.mubr.msk.f32.mxu0 %vm2885_vm0, %v2884_v1 }
  0x45   : > { %2324 = vmatmul.mubr.msk.f32.gmra.mxu0 %vm259_vm1, %v203_v16  ;;  %v245_v16 = vld [vmem:[%s2964_s7 + $0x1a8] sm:$0xff] }
  0x46   : > { %2326 = vmatprep.mubr.msk.f32.mxu0 %vm2885_vm0, %v2884_v1 }
  0x49   : > { %2327 = vmatmul.mubr.msk.f32.gmra.mxu0 %vm259_vm1, %v204_v17 }
  0x4a   : > { %2329 = vmatprep.mubr.msk.f32.mxu0 %vm2885_vm0, %v2884_v1 }
  0x4d   : > { %2330 = vmatmul.mubr.msk.f32.gmra.mxu0 %vm259_vm1, %v205_v18 }
  0x4e   : > { %2332 = vmatprep.mubr.msk.f32.mxu0 %vm2885_vm0, %v2884_v1 }
  0x51   : > { %2333 = vmatmul.mubr.msk.f32.gmra.mxu0 %vm259_vm1, %v206_v19 }
  0x52   : > { %2335 = vmatprep.mubr.msk.f32.mxu0 %vm2885_vm0, %v2884_v1 }
  0x55   : > { %2336 = vmatmul.mubr.msk.f32.gmra.mxu0 %vm259_vm1, %v207_v22 }
  0x56   : > { %2338 = vmatprep.mubr.msk.f32.mxu0 %vm2885_vm0, %v2884_v1 }
  0x59   : > { %2339 = vmatmul.mubr.msk.f32.gmra.mxu0 %vm259_vm1, %v208_v25 }
  0x5a   : > { %2341 = vmatprep.mubr.msk.f32.mxu0 %vm2885_vm0, %v2884_v1 }
  0x5d   : > { %2342 = vmatmul.mubr.msk.f32.gmra.mxu0 %vm259_vm1, %v209_v27 }
  0x5e   : > { %2344 = vmatprep.mubr.msk.f32.mxu0 %vm2885_vm0, %v2884_v1 }
  0x61   : > { %2345 = vmatmul.mubr.msk.f32.gmra.mxu0 %vm259_vm1, %v210_v30 }
  0x62   : > { %2347 = vmatprep.mubr.msk.f32.mxu0 %vm2885_vm0, %v2884_v1 }
  0x65   : > { %2348 = vmatmul.mubr.msk.f32.gmra.mxu0 %vm259_vm1, %v211_v32  ;;  %v249_v32 = vld [vmem:[%s2964_s7 + $0x1c8] sm:$0xff] }
  0x66   : > { %2350 = vmatprep.mubr.msk.f32.mxu0 %vm2885_vm0, %v2884_v1 }
  0x69   : > { %2351 = vmatmul.mubr.msk.f32.gmra.mxu0 %vm259_vm1, %v212_v33 }
  0x6a   : > { %2353 = vmatprep.mubr.msk.f32.mxu0 %vm2885_vm0, %v2884_v1 }
  0x6d   : > { %2354 = vmatmul.mubr.msk.f32.gmra.mxu0 %vm259_vm1, %v213_v34 }
  0x6e   : > { %2356 = vmatprep.mubr.msk.f32.mxu0 %vm2885_vm0, %v2884_v1 }
  0x71   : > { %2357 = vmatmul.mubr.msk.f32.gmra.mxu0 %vm259_vm1, %v214_v35 }
  0x72   : > { %2359 = vmatprep.mubr.msk.f32.mxu0 %vm2885_vm0, %v2884_v1 }
  0x75   : > { %2360 = vmatmul.mubr.msk.f32.gmra.mxu0 %vm259_vm1, %v215_v36  ;;  %v250_v36 = vld [vmem:[%s2964_s7 + $0x1d0] sm:$0xff] }
  0x76   : > { %2362 = vmatprep.mubr.msk.f32.mxu0 %vm2885_vm0, %v2884_v1 }
  0x79   : > { %2363 = vmatmul.mubr.msk.f32.gmra.mxu0 %vm259_vm1, %v216_v37 }
  0x7a   : > { %2365 = vmatprep.mubr.msk.f32.mxu0 %vm2885_vm0, %v2884_v1 }
  0x7d   : > { %2366 = vmatmul.mubr.msk.f32.gmra.mxu0 %vm259_vm1, %v217_v38 }
  0x7e   : > { %2368 = vmatprep.mubr.msk.f32.mxu0 %vm2885_vm0, %v2884_v1 }
  0x81   : > { %2369 = vmatmul.mubr.msk.f32.gmra.mxu0 %vm259_vm1, %v218_v39 }
  0x82   : > { %2371 = vmatprep.mubr.msk.f32.mxu0 %vm2885_vm0, %v2884_v1 }
  0x85   : > { %2372 = vmatmul.mubr.msk.f32.gmra.mxu0 %vm259_vm1, %v219_v40  ;;  %v251_v40 = vld [vmem:[%s2964_s7 + $0x1d8] sm:$0xff] }
  0x86   : > { %2374 = vmatprep.mubr.msk.f32.mxu0 %vm2885_vm0, %v2884_v1 }
  0x89   : > { %2375 = vmatmul.mubr.msk.f32.gmra.mxu0 %vm259_vm1, %v220_v41 }
  0x8a   : > { %2377 = vmatprep.mubr.msk.f32.mxu0 %vm2885_vm0, %v2884_v1 }
  0x8d   : > { %2378 = vmatmul.mubr.msk.f32.gmra.mxu0 %vm259_vm1, %v221_v42 }
  0x8e   : > { %2380 = vmatprep.mubr.msk.f32.mxu0 %vm2885_vm0, %v2884_v1 }
  0x91   : > { %2381 = vmatmul.mubr.msk.f32.gmra.mxu0 %vm259_vm1, %v222_v43 }
  0x92   : > { %2383 = vmatprep.mubr.msk.f32.mxu0 %vm2885_vm0, %v2884_v1 }
  0x95   : > { %2384 = vmatmul.mubr.msk.f32.gmra.mxu0 %vm259_vm1, %v223_v44  ;;  %v252_v44 = vld [vmem:[%s2964_s7 + $0x1e0] sm:$0xff] }
  0x96   : > { %2386 = vmatprep.mubr.msk.f32.mxu0 %vm2885_vm0, %v2884_v1 }
  0x99   : > { %2387 = vmatmul.mubr.msk.f32.gmra.mxu0 %vm259_vm1, %v224_v45 }
  0x9a   : > { %2389 = vmatprep.mubr.msk.f32.mxu0 %vm2885_vm0, %v2884_v1 }
  0x9d   : > { %2390 = vmatmul.mubr.msk.f32.gmra.mxu0 %vm259_vm1, %v225_v46 }
  0x9e   : > { %2392 = vmatprep.mubr.msk.f32.mxu0 %vm2885_vm0, %v2884_v1 }
  0xa1   : > { %2393 = vmatmul.mubr.msk.f32.gmra.mxu0 %vm259_vm1, %v226_v47 }
  0xa2   : > { %2395 = vmatprep.mubr.msk.f32.mxu0 %vm2885_vm0, %v2884_v1 }
  0xa5   : > { %2396 = vmatmul.mubr.msk.f32.gmra.mxu0 %vm259_vm1, %v227_v48  ;;  %v253_v48 = vld [vmem:[%s2964_s7 + $0x1e8] sm:$0xff] }
  0xa6   : > { %2398 = vmatprep.mubr.msk.f32.mxu0 %vm2885_vm0, %v2884_v1 }
  0xa9   : > { %2399 = vmatmul.mubr.msk.f32.gmra.mxu0 %vm259_vm1, %v228_v49 }
  0xaa   : > { %2401 = vmatprep.mubr.msk.f32.mxu0 %vm2885_vm0, %v2884_v1 }
  0xad   : > { %2402 = vmatmul.mubr.msk.f32.gmra.mxu0 %vm259_vm1, %v229_v50 }
  0xae   : > { %2404 = vmatprep.mubr.msk.f32.mxu0 %vm2885_vm0, %v2884_v1 }
  0xb1   : > { %2405 = vmatmul.mubr.msk.f32.gmra.mxu0 %vm259_vm1, %v230_v51 }
  0xb2   : > { %2407 = vmatprep.mubr.msk.f32.mxu0 %vm2885_vm0, %v2884_v1 }
  0xb5   : > { %2408 = vmatmul.mubr.msk.f32.gmra.mxu0 %vm259_vm1, %v231_v52  ;;  %v254_v52 = vld [vmem:[%s2964_s7 + $0x1f0] sm:$0xff]  ;;  %s2143_s7 = smul.u32 (%p2931_p4), 504, %s2919_s15 }
  0xb6   : > { %2410 = vmatprep.mubr.msk.f32.mxu0 %vm2885_vm0, %v2884_v1 }
  0xb7   : > { %s3581_s10 = scalar_lea.vmem (%p2931_p4), %s3776_s3, %s2143_s7  }
  0xb9   : > { %2411 = vmatmul.mubr.msk.f32.gmra.mxu0 %vm259_vm1, %v232_v53 }
  0xba   : > { %2413 = vmatprep.mubr.msk.f32.mxu0 %vm2885_vm0, %v2884_v1 }
  0xbd   : > { %2414 = vmatmul.mubr.msk.f32.gmra.mxu0 %vm259_vm1, %v233_v54 }
  0xbe   : > { %2416 = vmatprep.mubr.msk.f32.mxu0 %vm2885_vm0, %v2884_v1 }
  0xc1   : > { %2417 = vmatmul.mubr.msk.f32.gmra.mxu0 %vm259_vm1, %v234_v55 }
  0xc2   : > { %2419 = vmatprep.mubr.msk.f32.mxu0 %vm2885_vm0, %v2884_v1 }
  0xc5   : > { %2420 = vmatmul.mubr.msk.f32.gmra.mxu0 %vm259_vm1, %v235_v56 }
  0xc6   : > { %2422 = vmatprep.mubr.msk.f32.mxu0 %vm2885_vm0, %v2884_v1 }
  0xc9   : > { %2423 = vmatmul.mubr.msk.f32.gmra.mxu0 %vm259_vm1, %v236_v57 }
  0xca   : > { %2425 = vmatprep.mubr.msk.f32.mxu0 %vm2885_vm0, %v2884_v1 }
  0xcd   : > { %2426 = vmatmul.mubr.msk.f32.gmra.mxu0 %vm259_vm1, %v237_v58 }
  0xce   : > { %2428 = vmatprep.mubr.msk.f32.mxu0 %vm2885_vm0, %v2884_v1 }
  0xd1   : > { %2429 = vmatmul.mubr.msk.f32.gmra.mxu0 %vm259_vm1, %v238_v59 }
  0xd2   : > { %2431 = vmatprep.mubr.msk.f32.mxu0 %vm2885_vm0, %v2884_v1 }
  0xd5   : > { %2432 = vmatmul.mubr.msk.f32.gmra.mxu0 %vm259_vm1, %v239_v60 }
  0xd6   : > { %2434 = vmatprep.mubr.msk.f32.mxu0 %vm2885_vm0, %v2884_v1 }
  0xd9   : > { %v3198_v62 = vpop.f32.mrf.mxu0  ;;  %2435 = vmatmul.mubr.msk.f32.gmra.mxu0 %vm259_vm1, %v240_v61 }
  0xda   : > { %2437 = vmatprep.mubr.msk.f32.mxu0 %vm2885_vm0, %v2884_v1  ;;  %v829_v56 = vmax.f32 %v3198_v62, 0.0 }
  0xdb   : > { %v2292_v0 = vpop.f32.mrf.mxu0 }
  0xdd   : > { %v520_v2 = vpop.f32.mrf.mxu0  ;;  %2438 = vmatmul.mubr.msk.f32.gmra.mxu0 %vm259_vm1, %v241_v63 }
  0xde   : > { %v830_v3 = vmax.f32 %v520_v2, 0.0  ;;  %2440 = vmatprep.mubr.msk.f32.mxu0 %vm2885_vm0, %v2884_v1 }
  0xdf   : > { %v2295_v5 = vpop.f32.mrf.mxu0 }
  0xe0   : > { %2499 = vmatmul.mubr.msk.f32.vlgmr.msra.gmra.mxu1 %vm900_vm2, %v830_v3 }
  0xe1   : > { %v525_v6 = vpop.f32.mrf.mxu0  ;;  %2441 = vmatmul.mubr.msk.f32.gmra.mxu0 %vm259_vm1, %v242_v4  ;;  %2501 = vmatprep.mubr.msk.f32.mxu1 %vm2885_vm0, %v2884_v1 }
  0xe2   : > { %v831_v7 = vmax.f32 %v525_v6, 0.0  ;;  %2443 = vmatprep.mubr.msk.f32.mxu0 %vm2885_vm0, %v2884_v1 }
  0xe3   : > { %v2298_v9 = vpop.f32.mrf.mxu0 }
  0xe4   : > { %2502 = vmatmul.mubr.msk.f32.gmra.mxu1 %vm900_vm2, %v831_v7 }
  0xe5   : > { %v530_v10 = vpop.f32.mrf.mxu0  ;;  %2444 = vmatmul.mubr.msk.f32.gmra.mxu0 %vm259_vm1, %v243_v8  ;;  %2504 = vmatprep.mubr.msk.f32.mxu1 %vm2885_vm0, %v2884_v1 }
  0xe6   : > { %v832_v11 = vmax.f32 %v530_v10, 0.0  ;;  %2446 = vmatprep.mubr.msk.f32.mxu0 %vm2885_vm0, %v2884_v1 }
  0xe7   : > { %v2301_v13 = vpop.f32.mrf.mxu0 }
  0xe8   : > { %2505 = vmatmul.mubr.msk.f32.gmra.mxu1 %vm900_vm2, %v832_v11 }
  0xe9   : > { %v535_v14 = vpop.f32.mrf.mxu0  ;;  %2447 = vmatmul.mubr.msk.f32.gmra.mxu0 %vm259_vm1, %v244_v12  ;;  %2507 = vmatprep.mubr.msk.f32.mxu1 %vm2885_vm0, %v2884_v1 }
  0xea   : > { %v833_v15 = vmax.f32 %v535_v14, 0.0  ;;  %2449 = vmatprep.mubr.msk.f32.mxu0 %vm2885_vm0, %v2884_v1 }
  0xeb   : > { %v2304_v17 = vpop.f32.mrf.mxu0 }
  0xec   : > { %2508 = vmatmul.mubr.msk.f32.gmra.mxu1 %vm900_vm2, %v833_v15 }
  0xed   : > { %v540_v18 = vpop.f32.mrf.mxu0  ;;  %2450 = vmatmul.mubr.msk.f32.gmra.mxu0 %vm259_vm1, %v245_v16  ;;  %2510 = vmatprep.mubr.msk.f32.mxu1 %vm2885_vm0, %v2884_v1 }
  0xee   : > { %v834_v19 = vmax.f32 %v540_v18, 0.0  ;;  %2452 = vmatprep.mubr.msk.f32.mxu0 %vm2885_vm0, %v2884_v1 }
  0xef   : > { %v2307_v21 = vpop.f32.mrf.mxu0 }
  0xf0   : > { %2511 = vmatmul.mubr.msk.f32.gmra.mxu1 %vm900_vm2, %v834_v19 }
  0xf1   : > { %v545_v22 = vpop.f32.mrf.mxu0  ;;  %2453 = vmatmul.mubr.msk.f32.gmra.mxu0 %vm259_vm1, %v246_v20  ;;  %2513 = vmatprep.mubr.msk.f32.mxu1 %vm2885_vm0, %v2884_v1 }
  0xf2   : > { %v835_v23 = vmax.f32 %v545_v22, 0.0  ;;  %2455 = vmatprep.mubr.msk.f32.mxu0 %vm2885_vm0, %v2884_v1 }
  0xf3   : > { %v2310_v25 = vpop.f32.mrf.mxu0 }
  0xf4   : > { %2514 = vmatmul.mubr.msk.f32.gmra.mxu1 %vm900_vm2, %v835_v23 }
  0xf5   : > { %v550_v26 = vpop.f32.mrf.mxu0  ;;  %2456 = vmatmul.mubr.msk.f32.gmra.mxu0 %vm259_vm1, %v247_v24  ;;  %2516 = vmatprep.mubr.msk.f32.mxu1 %vm2885_vm0, %v2884_v1 }
  0xf6   : > { %v836_v27 = vmax.f32 %v550_v26, 0.0  ;;  %2458 = vmatprep.mubr.msk.f32.mxu0 %vm2885_vm0, %v2884_v1 }
  0xf7   : > { %v2313_v29 = vpop.f32.mrf.mxu0 }
  0xf8   : > { %2517 = vmatmul.mubr.msk.f32.gmra.mxu1 %vm900_vm2, %v836_v27 }
  0xf9   : > { %v555_v30 = vpop.f32.mrf.mxu0  ;;  %2459 = vmatmul.mubr.msk.f32.gmra.mxu0 %vm259_vm1, %v248_v28  ;;  %2519 = vmatprep.mubr.msk.f32.mxu1 %vm2885_vm0, %v2884_v1 }
  0xfa   : > { %v837_v31 = vmax.f32 %v555_v30, 0.0  ;;  %2461 = vmatprep.mubr.msk.f32.mxu0 %vm2885_vm0, %v2884_v1 }
  0xfb   : > { %v2316_v33 = vpop.f32.mrf.mxu0 }
  0xfc   : > { %2520 = vmatmul.mubr.msk.f32.gmra.mxu1 %vm900_vm2, %v837_v31 }
  0xfd   : > { %v560_v34 = vpop.f32.mrf.mxu0  ;;  %2462 = vmatmul.mubr.msk.f32.gmra.mxu0 %vm259_vm1, %v249_v32  ;;  %2522 = vmatprep.mubr.msk.f32.mxu1 %vm2885_vm0, %v2884_v1 }
  0xfe   : > { %v838_v35 = vmax.f32 %v560_v34, 0.0  ;;  %2464 = vmatprep.mubr.msk.f32.mxu0 %vm2885_vm0, %v2884_v1 }
  0xff   : > { %v2319_v37 = vpop.f32.mrf.mxu0 }
 0x100   : > { %2523 = vmatmul.mubr.msk.f32.gmra.mxu1 %vm900_vm2, %v838_v35 }
 0x101   : > { %v565_v38 = vpop.f32.mrf.mxu0  ;;  %2465 = vmatmul.mubr.msk.f32.gmra.mxu0 %vm259_vm1, %v250_v36  ;;  %2525 = vmatprep.mubr.msk.f32.mxu1 %vm2885_vm0, %v2884_v1 }
 0x102   : > { %v839_v39 = vmax.f32 %v565_v38, 0.0  ;;  %2467 = vmatprep.mubr.msk.f32.mxu0 %vm2885_vm0, %v2884_v1 }
 0x103   : > { %v2322_v41 = vpop.f32.mrf.mxu0 }
 0x104   : > { %2526 = vmatmul.mubr.msk.f32.gmra.mxu1 %vm900_vm2, %v839_v39 }
 0x105   : > { %v570_v42 = vpop.f32.mrf.mxu0  ;;  %2468 = vmatmul.mubr.msk.f32.gmra.mxu0 %vm259_vm1, %v251_v40  ;;  %2528 = vmatprep.mubr.msk.f32.mxu1 %vm2885_vm0, %v2884_v1 }
 0x106   : > { %v840_v43 = vmax.f32 %v570_v42, 0.0  ;;  %2470 = vmatprep.mubr.msk.f32.mxu0 %vm2885_vm0, %v2884_v1 }
 0x107   : > { %v2325_v45 = vpop.f32.mrf.mxu0 }
 0x108   : > { %2529 = vmatmul.mubr.msk.f32.gmra.mxu1 %vm900_vm2, %v840_v43 }
 0x109   : > { %v575_v46 = vpop.f32.mrf.mxu0  ;;  %2471 = vmatmul.mubr.msk.f32.gmra.mxu0 %vm259_vm1, %v252_v44  ;;  %2531 = vmatprep.mubr.msk.f32.mxu1 %vm2885_vm0, %v2884_v1 }
 0x10a   : > { %v841_v47 = vmax.f32 %v575_v46, 0.0  ;;  %2473 = vmatprep.mubr.msk.f32.mxu0 %vm2885_vm0, %v2884_v1 }
 0x10b   : > { %v2328_v49 = vpop.f32.mrf.mxu0 }
 0x10c   : > { %2532 = vmatmul.mubr.msk.f32.gmra.mxu1 %vm900_vm2, %v841_v47 }
 0x10d   : > { %v580_v50 = vpop.f32.mrf.mxu0  ;;  %2474 = vmatmul.mubr.msk.f32.gmra.mxu0 %vm259_vm1, %v253_v48  ;;  %2534 = vmatprep.mubr.msk.f32.mxu1 %vm2885_vm0, %v2884_v1 }
 0x10e   : > { %v842_v51 = vmax.f32 %v580_v50, 0.0  ;;  %2476 = vmatprep.mubr.msk.f32.mxu0 %vm2885_vm0, %v2884_v1 }
 0x10f   : > { %v2331_v53 = vpop.f32.mrf.mxu0 }
 0x110   : > { %2535 = vmatmul.mubr.msk.f32.gmra.mxu1 %vm900_vm2, %v842_v51 }
 0x111   : > { %v585_v54 = vpop.f32.mrf.mxu0  ;;  %2477 = vmatmul.mubr.msk.f32.gmra.mxu0 %vm259_vm1, %v254_v52  ;;  %2537 = vmatprep.mubr.msk.f32.mxu1 %vm2885_vm0, %v2884_v1 }
 0x112   : > { %v843_v55 = vmax.f32 %v585_v54, 0.0  ;;  %2495 = vmatprep.mubr.msk.f32.mxu0 %vm2885_vm0, %v2884_v1 }
 0x113   : > { %v2334_v57 = vpop.f32.mrf.mxu0 }
 0x114   : > { %2538 = vmatmul.mubr.msk.f32.gmra.mxu1 %vm900_vm2, %v843_v55 }
 0x115   : > { %v590_v58 = vpop.f32.mrf.mxu0  ;;  %2496 = vmatmul.mubr.msk.f32.vlgmr.msra.gmra.mxu0 %vm900_vm2, %v829_v56  ;;  %2540 = vmatprep.mubr.msk.f32.mxu1 %vm2885_vm0, %v2884_v1 }
 0x116   : > { %v844_v59 = vmax.f32 %v590_v58, 0.0 }
 0x117   : > { %v2337_v60 = vpop.f32.mrf.mxu0 }
 0x118   : > { %2541 = vmatmul.mubr.msk.f32.gmra.mxu1 %vm900_vm2, %v844_v59 }
 0x119   : > { %v595_v61 = vpop.f32.mrf.mxu0  ;;  %2543 = vmatprep.mubr.msk.f32.mxu1 %vm2885_vm0, %v2884_v1 }
 0x11a   : > { %v845_v63 = vmax.f32 %v595_v61, 0.0 }
 0x11b   : > { %v2340_v0 = vpop.f32.mrf.mxu0 }
 0x11c   : > { %2544 = vmatmul.mubr.msk.f32.gmra.mxu1 %vm900_vm2, %v845_v63 }
 0x11d   : > { %v600_v62 = vpop.f32.mrf.mxu0  ;;  %2546 = vmatprep.mubr.msk.f32.mxu1 %vm2885_vm0, %v2884_v1 }
 0x11e   : > { %v846_v2 = vmax.f32 %v600_v62, 0.0 }
 0x11f   : > { %v2343_v3 = vpop.f32.mrf.mxu0 }
 0x120   : > { %2547 = vmatmul.mubr.msk.f32.gmra.mxu1 %vm900_vm2, %v846_v2 }
 0x121   : > { %v605_v4 = vpop.f32.mrf.mxu0  ;;  %2549 = vmatprep.mubr.msk.f32.mxu1 %vm2885_vm0, %v2884_v1 }
 0x122   : > { %v847_v5 = vmax.f32 %v605_v4, 0.0 }
 0x123   : > { %v2346_v6 = vpop.f32.mrf.mxu0 }
 0x124   : > { %2550 = vmatmul.mubr.msk.f32.gmra.mxu1 %vm900_vm2, %v847_v5 }
 0x125   : > { %v610_v7 = vpop.f32.mrf.mxu0  ;;  %2552 = vmatprep.mubr.msk.f32.mxu1 %vm2885_vm0, %v2884_v1 }
 0x126   : > { %v848_v8 = vmax.f32 %v610_v7, 0.0 }
 0x127   : > { %v2349_v9 = vpop.f32.mrf.mxu0 }
 0x128   : > { %2553 = vmatmul.mubr.msk.f32.gmra.mxu1 %vm900_vm2, %v848_v8 }
 0x129   : > { %v615_v10 = vpop.f32.mrf.mxu0  ;;  %2555 = vmatprep.mubr.msk.f32.mxu1 %vm2885_vm0, %v2884_v1 }
 0x12a   : > { %v849_v11 = vmax.f32 %v615_v10, 0.0 }
 0x12b   : > { %v2352_v12 = vpop.f32.mrf.mxu0 }
 0x12c   : > { %2556 = vmatmul.mubr.msk.f32.gmra.mxu1 %vm900_vm2, %v849_v11 }
 0x12d   : > { %v620_v13 = vpop.f32.mrf.mxu0  ;;  %2558 = vmatprep.mubr.msk.f32.mxu1 %vm2885_vm0, %v2884_v1 }
 0x12e   : > { %v850_v14 = vmax.f32 %v620_v13, 0.0 }
 0x12f   : > { %v2355_v15 = vpop.f32.mrf.mxu0 }
 0x130   : > { %2559 = vmatmul.mubr.msk.f32.gmra.mxu1 %vm900_vm2, %v850_v14 }
 0x131   : > { %v625_v16 = vpop.f32.mrf.mxu0  ;;  %2561 = vmatprep.mubr.msk.f32.mxu1 %vm2885_vm0, %v2884_v1 }
 0x132   : > { %v851_v17 = vmax.f32 %v625_v16, 0.0 }
 0x133   : > { %v2358_v18 = vpop.f32.mrf.mxu0 }
 0x134   : > { %2562 = vmatmul.mubr.msk.f32.gmra.mxu1 %vm900_vm2, %v851_v17 }
 0x135   : > { %v630_v19 = vpop.f32.mrf.mxu0  ;;  %2564 = vmatprep.mubr.msk.f32.mxu1 %vm2885_vm0, %v2884_v1 }
 0x136   : > { %v852_v20 = vmax.f32 %v630_v19, 0.0 }
 0x137   : > { %v2361_v21 = vpop.f32.mrf.mxu0 }
 0x138   : > { %2565 = vmatmul.mubr.msk.f32.gmra.mxu1 %vm900_vm2, %v852_v20 }
 0x139   : > { %v635_v22 = vpop.f32.mrf.mxu0  ;;  %2567 = vmatprep.mubr.msk.f32.mxu1 %vm2885_vm0, %v2884_v1 }
 0x13a   : > { %v853_v23 = vmax.f32 %v635_v22, 0.0 }
 0x13b   : > { %v2364_v24 = vpop.f32.mrf.mxu0 }
 0x13c   : > { %2568 = vmatmul.mubr.msk.f32.gmra.mxu1 %vm900_vm2, %v853_v23 }
 0x13d   : > { %v640_v25 = vpop.f32.mrf.mxu0  ;;  %2570 = vmatprep.mubr.msk.f32.mxu1 %vm2885_vm0, %v2884_v1 }
 0x13e   : > { %v854_v26 = vmax.f32 %v640_v25, 0.0 }
 0x13f   : > { %v2367_v27 = vpop.f32.mrf.mxu0 }
 0x140   : > { %2571 = vmatmul.mubr.msk.f32.gmra.mxu1 %vm900_vm2, %v854_v26 }
 0x141   : > { %v645_v28 = vpop.f32.mrf.mxu0  ;;  %2573 = vmatprep.mubr.msk.f32.mxu1 %vm2885_vm0, %v2884_v1 }
 0x142   : > { %v855_v29 = vmax.f32 %v645_v28, 0.0 }
 0x143   : > { %v2370_v30 = vpop.f32.mrf.mxu0 }
 0x144   : > { %2574 = vmatmul.mubr.msk.f32.gmra.mxu1 %vm900_vm2, %v855_v29 }
 0x145   : > { %v650_v31 = vpop.f32.mrf.mxu0  ;;  %2576 = vmatprep.mubr.msk.f32.mxu1 %vm2885_vm0, %v2884_v1 }
 0x146   : > { %v856_v32 = vmax.f32 %v650_v31, 0.0 }
 0x147   : > { %v2373_v33 = vpop.f32.mrf.mxu0 }
 0x148   : > { %2577 = vmatmul.mubr.msk.f32.gmra.mxu1 %vm900_vm2, %v856_v32 }
 0x149   : > { %v655_v34 = vpop.f32.mrf.mxu0  ;;  %2579 = vmatprep.mubr.msk.f32.mxu1 %vm2885_vm0, %v2884_v1 }
 0x14a   : > { %v857_v35 = vmax.f32 %v655_v34, 0.0 }
 0x14b   : > { %v2376_v36 = vpop.f32.mrf.mxu0 }
 0x14c   : > { %2580 = vmatmul.mubr.msk.f32.gmra.mxu1 %vm900_vm2, %v857_v35 }
 0x14d   : > { %v660_v37 = vpop.f32.mrf.mxu0  ;;  %2582 = vmatprep.mubr.msk.f32.mxu1 %vm2885_vm0, %v2884_v1 }
 0x14e   : > { %v858_v38 = vmax.f32 %v660_v37, 0.0 }
 0x14f   : > { %v2379_v39 = vpop.f32.mrf.mxu0 }
 0x150   : > { %2583 = vmatmul.mubr.msk.f32.gmra.mxu1 %vm900_vm2, %v858_v38 }
 0x151   : > { %v665_v40 = vpop.f32.mrf.mxu0  ;;  %2585 = vmatprep.mubr.msk.f32.mxu1 %vm2885_vm0, %v2884_v1 }
 0x152   : > { %v859_v41 = vmax.f32 %v665_v40, 0.0 }
 0x153   : > { %v2382_v42 = vpop.f32.mrf.mxu0 }
 0x154   : > { %2586 = vmatmul.mubr.msk.f32.gmra.mxu1 %vm900_vm2, %v859_v41 }
 0x155   : > { %v670_v43 = vpop.f32.mrf.mxu0  ;;  %2588 = vmatprep.mubr.msk.f32.mxu1 %vm2885_vm0, %v2884_v1 }
 0x156   : > { %v860_v44 = vmax.f32 %v670_v43, 0.0 }
 0x157   : > { %v2385_v45 = vpop.f32.mrf.mxu0 }
 0x158   : > { %2589 = vmatmul.mubr.msk.f32.gmra.mxu1 %vm900_vm2, %v860_v44 }
 0x159   : > { %v675_v46 = vpop.f32.mrf.mxu0  ;;  %2591 = vmatprep.mubr.msk.f32.mxu1 %vm2885_vm0, %v2884_v1 }
 0x15a   : > { %v861_v47 = vmax.f32 %v675_v46, 0.0 }
 0x15b   : > { %v2388_v48 = vpop.f32.mrf.mxu0 }
 0x15c   : > { %2592 = vmatmul.mubr.msk.f32.gmra.mxu1 %vm900_vm2, %v861_v47 }
 0x15d   : > { %v680_v49 = vpop.f32.mrf.mxu0  ;;  %2594 = vmatprep.mubr.msk.f32.mxu1 %vm2885_vm0, %v2884_v1 }
 0x15e   : > { %v862_v50 = vmax.f32 %v680_v49, 0.0 }
 0x15f   : > { %v2391_v51 = vpop.f32.mrf.mxu0 }
 0x160   : > { %2595 = vmatmul.mubr.msk.f32.gmra.mxu1 %vm900_vm2, %v862_v50 }
 0x161   : > { %v685_v52 = vpop.f32.mrf.mxu0  ;;  %2597 = vmatprep.mubr.msk.f32.mxu1 %vm2885_vm0, %v2884_v1 }
 0x162   : > { %v863_v53 = vmax.f32 %v685_v52, 0.0 }
 0x163   : > { %v2394_v54 = vpop.f32.mrf.mxu0 }
 0x164   : > { %2598 = vmatmul.mubr.msk.f32.gmra.mxu1 %vm900_vm2, %v863_v53 }
 0x165   : > { %v690_v55 = vpop.f32.mrf.mxu0  ;;  %2600 = vmatprep.mubr.msk.f32.mxu1 %vm2885_vm0, %v2884_v1 }
 0x166   : > { %v864_v56 = vmax.f32 %v690_v55, 0.0 }
 0x167   : > { %v2397_v57 = vpop.f32.mrf.mxu0 }
 0x168   : > { %2601 = vmatmul.mubr.msk.f32.gmra.mxu1 %vm900_vm2, %v864_v56 }
 0x169   : > { %v695_v58 = vpop.f32.mrf.mxu0  ;;  %2603 = vmatprep.mubr.msk.f32.mxu1 %vm2885_vm0, %v2884_v1 }
 0x16a   : > { %v865_v59 = vmax.f32 %v695_v58, 0.0 }
 0x16b   : > { %v2400_v60 = vpop.f32.mrf.mxu0 }
 0x16c   : > { %2604 = vmatmul.mubr.msk.f32.gmra.mxu1 %vm900_vm2, %v865_v59 }
 0x16d   : > { %v700_v61 = vpop.f32.mrf.mxu0  ;;  %2606 = vmatprep.mubr.msk.f32.mxu1 %vm2885_vm0, %v2884_v1 }
 0x16e   : > { %v866_v63 = vmax.f32 %v700_v61, 0.0 }
 0x16f   : > { %v2403_v0 = vpop.f32.mrf.mxu0 }
 0x170   : > { %2607 = vmatmul.mubr.msk.f32.gmra.mxu1 %vm900_vm2, %v866_v63 }
 0x171   : > { %v705_v62 = vpop.f32.mrf.mxu0  ;;  %2609 = vmatprep.mubr.msk.f32.mxu1 %vm2885_vm0, %v2884_v1 }
 0x172   : > { %v867_v2 = vmax.f32 %v705_v62, 0.0 }
 0x173   : > { %v2406_v3 = vpop.f32.mrf.mxu0 }
 0x174   : > { %2610 = vmatmul.mubr.msk.f32.gmra.mxu1 %vm900_vm2, %v867_v2 }
 0x175   : > { %v710_v4 = vpop.f32.mrf.mxu0  ;;  %2612 = vmatprep.mubr.msk.f32.mxu1 %vm2885_vm0, %v2884_v1 }
 0x176   : > { %v868_v5 = vmax.f32 %v710_v4, 0.0 }
 0x177   : > { %v2409_v6 = vpop.f32.mrf.mxu0 }
 0x178   : > { %2613 = vmatmul.mubr.msk.f32.gmra.mxu1 %vm900_vm2, %v868_v5 }
 0x179   : > { %v715_v7 = vpop.f32.mrf.mxu0  ;;  %2615 = vmatprep.mubr.msk.f32.mxu1 %vm2885_vm0, %v2884_v1 }
 0x17a   : > { %v869_v8 = vmax.f32 %v715_v7, 0.0 }
 0x17b   : > { %v2412_v9 = vpop.f32.mrf.mxu0 }
 0x17c   : > { %2616 = vmatmul.mubr.msk.f32.gmra.mxu1 %vm900_vm2, %v869_v8 }
 0x17d   : > { %v720_v10 = vpop.f32.mrf.mxu0  ;;  %2618 = vmatprep.mubr.msk.f32.mxu1 %vm2885_vm0, %v2884_v1 }
 0x17e   : > { %v870_v11 = vmax.f32 %v720_v10, 0.0 }
 0x17f   : > { %v2415_v12 = vpop.f32.mrf.mxu0 }
 0x180   : > { %2619 = vmatmul.mubr.msk.f32.gmra.mxu1 %vm900_vm2, %v870_v11 }
 0x181   : > { %v725_v13 = vpop.f32.mrf.mxu0  ;;  %2621 = vmatprep.mubr.msk.f32.mxu1 %vm2885_vm0, %v2884_v1 }
 0x182   : > { %v871_v14 = vmax.f32 %v725_v13, 0.0 }
 0x183   : > { %v2418_v15 = vpop.f32.mrf.mxu0 }
 0x184   : > { %2622 = vmatmul.mubr.msk.f32.gmra.mxu1 %vm900_vm2, %v871_v14 }
 0x185   : > { %v730_v16 = vpop.f32.mrf.mxu0  ;;  %2624 = vmatprep.mubr.msk.f32.mxu1 %vm2885_vm0, %v2884_v1 }
 0x186   : > { %v872_v17 = vmax.f32 %v730_v16, 0.0 }
 0x187   : > { %v2421_v18 = vpop.f32.mrf.mxu0 }
 0x188   : > { %2625 = vmatmul.mubr.msk.f32.gmra.mxu1 %vm900_vm2, %v872_v17 }
 0x189   : > { %v735_v19 = vpop.f32.mrf.mxu0  ;;  %2627 = vmatprep.mubr.msk.f32.mxu1 %vm2885_vm0, %v2884_v1 }
 0x18a   : > { %v873_v20 = vmax.f32 %v735_v19, 0.0 }
 0x18b   : > { %v2424_v21 = vpop.f32.mrf.mxu0 }
 0x18c   : > { %2628 = vmatmul.mubr.msk.f32.gmra.mxu1 %vm900_vm2, %v873_v20 }
 0x18d   : > { %v740_v22 = vpop.f32.mrf.mxu0  ;;  %2630 = vmatprep.mubr.msk.f32.mxu1 %vm2885_vm0, %v2884_v1 }
 0x18e   : > { %v874_v23 = vmax.f32 %v740_v22, 0.0 }
 0x18f   : > { %v2427_v24 = vpop.f32.mrf.mxu0 }
 0x190   : > { %2631 = vmatmul.mubr.msk.f32.gmra.mxu1 %vm900_vm2, %v874_v23 }
 0x191   : > { %v745_v25 = vpop.f32.mrf.mxu0  ;;  %2633 = vmatprep.mubr.msk.f32.mxu1 %vm2885_vm0, %v2884_v1 }
 0x192   : > { %v875_v26 = vmax.f32 %v745_v25, 0.0 }
 0x193   : > { %v2430_v27 = vpop.f32.mrf.mxu0 }
 0x194   : > { %2634 = vmatmul.mubr.msk.f32.gmra.mxu1 %vm900_vm2, %v875_v26 }
 0x195   : > { %v750_v28 = vpop.f32.mrf.mxu0  ;;  %2636 = vmatprep.mubr.msk.f32.mxu1 %vm2885_vm0, %v2884_v1 }
 0x196   : > { %v876_v29 = vmax.f32 %v750_v28, 0.0 }
 0x197   : > { %v2433_v30 = vpop.f32.mrf.mxu0 }
 0x198   : > { %2637 = vmatmul.mubr.msk.f32.gmra.mxu1 %vm900_vm2, %v876_v29 }
 0x199   : > { %v755_v31 = vpop.f32.mrf.mxu0  ;;  %2639 = vmatprep.mubr.msk.f32.mxu1 %vm2885_vm0, %v2884_v1 }
 0x19a   : > { %v877_v32 = vmax.f32 %v755_v31, 0.0 }
 0x19b   : > { %v2436_v33 = vpop.f32.mrf.mxu0 }
 0x19c   : > { %2640 = vmatmul.mubr.msk.f32.gmra.mxu1 %vm900_vm2, %v877_v32 }
 0x19d   : > { %v760_v34 = vpop.f32.mrf.mxu0  ;;  %2642 = vmatprep.mubr.msk.f32.mxu1 %vm2885_vm0, %v2884_v1 }
 0x19e   : > { %v878_v35 = vmax.f32 %v760_v34, 0.0 }
 0x19f   : > { %v2439_v36 = vpop.f32.mrf.mxu0 }
 0x1a0   : > { %v1161_v37 = vpop.f32.mrf.mxu1  ;;  %2643 = vmatmul.mubr.msk.f32.gmra.mxu1 %vm900_vm2, %v878_v35 }
 0x1a1   : > { %1472 = vst.msk [vmem:[%s3407_s12 + $0x8] sm:$0xff] %vm1470_vm3, %v1161_v37  ;;  %v765_v38 = vpop.f32.mrf.mxu0  ;;  %2645 = vmatprep.mubr.msk.f32.mxu1 %vm2885_vm0, %v2884_v1 }
 0x1a2   : > { %v879_v39 = vmax.f32 %v765_v38, 0.0  ;;  %v2500_v40 = vpop.f32.mrf.mxu1 }
 0x1a3   : > { %v2442_v41 = vpop.f32.mrf.mxu0 }
 0x1a4   : > { %v1166_v42 = vpop.f32.mrf.mxu1  ;;  %2646 = vmatmul.mubr.msk.f32.gmra.mxu1 %vm900_vm2, %v879_v39 }
 0x1a5   : > { %1473 = vst.msk [vmem:[%s3407_s12 + $0x10] sm:$0xff] %vm1470_vm3, %v1166_v42  ;;  %v770_v43 = vpop.f32.mrf.mxu0  ;;  %2648 = vmatprep.mubr.msk.f32.mxu1 %vm2885_vm0, %v2884_v1 }
 0x1a6   : > { %v880_v44 = vmax.f32 %v770_v43, 0.0  ;;  %v2503_v45 = vpop.f32.mrf.mxu1 }
 0x1a7   : > { %v2445_v46 = vpop.f32.mrf.mxu0 }
 0x1a8   : > { %v1171_v47 = vpop.f32.mrf.mxu1  ;;  %2649 = vmatmul.mubr.msk.f32.gmra.mxu1 %vm900_vm2, %v880_v44 }
 0x1a9   : > { %1474 = vst.msk [vmem:[%s3407_s12 + $0x18] sm:$0xff] %vm1470_vm3, %v1171_v47  ;;  %v775_v48 = vpop.f32.mrf.mxu0  ;;  %2651 = vmatprep.mubr.msk.f32.mxu1 %vm2885_vm0, %v2884_v1 }
 0x1aa   : > { %v881_v49 = vmax.f32 %v775_v48, 0.0  ;;  %v2506_v50 = vpop.f32.mrf.mxu1 }
 0x1ab   : > { %v2448_v51 = vpop.f32.mrf.mxu0 }
 0x1ac   : > { %v1176_v52 = vpop.f32.mrf.mxu1  ;;  %2652 = vmatmul.mubr.msk.f32.gmra.mxu1 %vm900_vm2, %v881_v49 }
 0x1ad   : > { %1475 = vst.msk [vmem:[%s3407_s12 + $0x20] sm:$0xff] %vm1470_vm3, %v1176_v52  ;;  %v780_v53 = vpop.f32.mrf.mxu0  ;;  %2654 = vmatprep.mubr.msk.f32.mxu1 %vm2885_vm0, %v2884_v1 }
 0x1ae   : > { %v882_v54 = vmax.f32 %v780_v53, 0.0  ;;  %v2509_v55 = vpop.f32.mrf.mxu1 }
 0x1af   : > { %v2451_v56 = vpop.f32.mrf.mxu0 }
 0x1b0   : > { %v1181_v57 = vpop.f32.mrf.mxu1  ;;  %2655 = vmatmul.mubr.msk.f32.gmra.mxu1 %vm900_vm2, %v882_v54 }
 0x1b1   : > { %1476 = vst.msk [vmem:[%s3407_s12 + $0x28] sm:$0xff] %vm1470_vm3, %v1181_v57  ;;  %v785_v58 = vpop.f32.mrf.mxu0  ;;  %2657 = vmatprep.mubr.msk.f32.mxu1 %vm2885_vm0, %v2884_v1 }
 0x1b2   : > { %v883_v59 = vmax.f32 %v785_v58, 0.0  ;;  %v2512_v60 = vpop.f32.mrf.mxu1 }
 0x1b3   : > { %v2454_v61 = vpop.f32.mrf.mxu0 }
 0x1b4   : > { %v1186_v63 = vpop.f32.mrf.mxu1  ;;  %2658 = vmatmul.mubr.msk.f32.gmra.mxu1 %vm900_vm2, %v883_v59 }
 0x1b5   : > { %1477 = vst.msk [vmem:[%s3407_s12 + $0x30] sm:$0xff] %vm1470_vm3, %v1186_v63  ;;  %v790_v0 = vpop.f32.mrf.mxu0  ;;  %2660 = vmatprep.mubr.msk.f32.mxu1 %vm2885_vm0, %v2884_v1 }
 0x1b6   : > { %v884_v62 = vmax.f32 %v790_v0, 0.0  ;;  %v2515_v2 = vpop.f32.mrf.mxu1 }
 0x1b7   : > { %v2457_v3 = vpop.f32.mrf.mxu0 }
 0x1b8   : > { %v1191_v4 = vpop.f32.mrf.mxu1  ;;  %2661 = vmatmul.mubr.msk.f32.gmra.mxu1 %vm900_vm2, %v884_v62 }
 0x1b9   : > { %1478 = vst.msk [vmem:[%s3407_s12 + $0x38] sm:$0xff] %vm1470_vm3, %v1191_v4  ;;  %v795_v5 = vpop.f32.mrf.mxu0  ;;  %2663 = vmatprep.mubr.msk.f32.mxu1 %vm2885_vm0, %v2884_v1 }
 0x1ba   : > { %v885_v6 = vmax.f32 %v795_v5, 0.0  ;;  %v2518_v7 = vpop.f32.mrf.mxu1 }
 0x1bb   : > { %v2460_v8 = vpop.f32.mrf.mxu0 }
 0x1bc   : > { %v1196_v9 = vpop.f32.mrf.mxu1  ;;  %2664 = vmatmul.mubr.msk.f32.gmra.mxu1 %vm900_vm2, %v885_v6 }
 0x1bd   : > { %1479 = vst.msk [vmem:[%s3407_s12 + $0x40] sm:$0xff] %vm1470_vm3, %v1196_v9  ;;  %v800_v10 = vpop.f32.mrf.mxu0  ;;  %2666 = vmatprep.mubr.msk.f32.mxu1 %vm2885_vm0, %v2884_v1 }
 0x1be   : > { %v886_v11 = vmax.f32 %v800_v10, 0.0  ;;  %v2521_v12 = vpop.f32.mrf.mxu1 }
 0x1bf   : > { %v2463_v13 = vpop.f32.mrf.mxu0 }
 0x1c0   : > { %v1201_v14 = vpop.f32.mrf.mxu1  ;;  %2667 = vmatmul.mubr.msk.f32.gmra.mxu1 %vm900_vm2, %v886_v11 }
 0x1c1   : > { %1480 = vst.msk [vmem:[%s3407_s12 + $0x48] sm:$0xff] %vm1470_vm3, %v1201_v14  ;;  %v805_v15 = vpop.f32.mrf.mxu0  ;;  %2669 = vmatprep.mubr.msk.f32.mxu1 %vm2885_vm0, %v2884_v1 }
 0x1c2   : > { %v887_v16 = vmax.f32 %v805_v15, 0.0  ;;  %v2524_v17 = vpop.f32.mrf.mxu1 }
 0x1c3   : > { %v2466_v18 = vpop.f32.mrf.mxu0 }
 0x1c4   : > { %v1206_v19 = vpop.f32.mrf.mxu1  ;;  %2670 = vmatmul.mubr.msk.f32.gmra.mxu1 %vm900_vm2, %v887_v16 }
 0x1c5   : > { %1481 = vst.msk [vmem:[%s3407_s12 + $0x50] sm:$0xff] %vm1470_vm3, %v1206_v19  ;;  %v810_v20 = vpop.f32.mrf.mxu0  ;;  %2672 = vmatprep.mubr.msk.f32.mxu1 %vm2885_vm0, %v2884_v1 }
 0x1c6   : > { %v888_v21 = vmax.f32 %v810_v20, 0.0  ;;  %v2527_v22 = vpop.f32.mrf.mxu1 }
 0x1c7   : > { %v2469_v23 = vpop.f32.mrf.mxu0 }
 0x1c8   : > { %v1211_v24 = vpop.f32.mrf.mxu1  ;;  %2673 = vmatmul.mubr.msk.f32.gmra.mxu1 %vm900_vm2, %v888_v21 }
 0x1c9   : > { %1482 = vst.msk [vmem:[%s3407_s12 + $0x58] sm:$0xff] %vm1470_vm3, %v1211_v24  ;;  %v815_v25 = vpop.f32.mrf.mxu0  ;;  %2675 = vmatprep.mubr.msk.f32.mxu1 %vm2885_vm0, %v2884_v1 }
 0x1ca   : > { %v889_v26 = vmax.f32 %v815_v25, 0.0  ;;  %v2530_v27 = vpop.f32.mrf.mxu1 }
 0x1cb   : > { %v2472_v28 = vpop.f32.mrf.mxu0 }
 0x1cc   : > { %v1216_v29 = vpop.f32.mrf.mxu1  ;;  %2676 = vmatmul.mubr.msk.f32.gmra.mxu1 %vm900_vm2, %v889_v26 }
 0x1cd   : > { %1483 = vst.msk [vmem:[%s3407_s12 + $0x60] sm:$0xff] %vm1470_vm3, %v1216_v29  ;;  %v820_v30 = vpop.f32.mrf.mxu0  ;;  %2678 = vmatprep.mubr.msk.f32.mxu1 %vm2885_vm0, %v2884_v1 }
 0x1ce   : > { %v890_v31 = vmax.f32 %v820_v30, 0.0  ;;  %v2533_v32 = vpop.f32.mrf.mxu1 }
 0x1cf   : > { %v2475_v33 = vpop.f32.mrf.mxu0 }
 0x1d0   : > { %v1221_v34 = vpop.f32.mrf.mxu1  ;;  %2679 = vmatmul.mubr.msk.f32.gmra.mxu1 %vm900_vm2, %v890_v31 }
 0x1d1   : > { %1484 = vst.msk [vmem:[%s3407_s12 + $0x68] sm:$0xff] %vm1470_vm3, %v1221_v34  ;;  %v825_v35 = vpop.f32.mrf.mxu0  ;;  %2681 = vmatprep.mubr.msk.f32.mxu1 %vm2885_vm0, %v2884_v1 }
 0x1d2   : > { %v891_v36 = vmax.f32 %v825_v35, 0.0  ;;  %v2536_v37 = vpop.f32.mrf.mxu1 }
 0x1d3   : > { %v2478_v38 = vpop.f32.mrf.mxu0 }
 0x1d4   : > { %v1226_v39 = vpop.f32.mrf.mxu1  ;;  %2682 = vmatmul.mubr.msk.f32.gmra.mxu1 %vm900_vm2, %v891_v36 }
 0x1d5   : > { %1485 = vst.msk [vmem:[%s3407_s12 + $0x70] sm:$0xff] %vm1470_vm3, %v1226_v39  ;;  %v1156_v40 = vpop.f32.mrf.mxu0 }
 0x1d6   : > { %1471 = vst.msk [vmem:[%s3407_s12] sm:$0xff] %vm1470_vm3, %v1156_v40  ;;  %v2539_v41 = vpop.f32.mrf.mxu1 }
 0x1d7   : > { %v2497_v42 = vpop.f32.mrf.mxu0 }
 0x1d8   : > { %v1231_v43 = vpop.f32.mrf.mxu1 }
 0x1d9   : > { %1486 = vst.msk [vmem:[%s3407_s12 + $0x78] sm:$0xff] %vm1470_vm3, %v1231_v43 }
 0x1da   : > { %v2542_v1 = vpop.f32.mrf.mxu1 }
 0x1dc   : > { %v1236_v44 = vpop.f32.mrf.mxu1 }
 0x1dd   : > { %1487 = vst.msk [vmem:[%s3407_s12 + $0x80] sm:$0xff] %vm1470_vm3, %v1236_v44 }
 0x1de   : > { %v2545_v45 = vpop.f32.mrf.mxu1 }
 0x1e0   : > { %v1241_v46 = vpop.f32.mrf.mxu1 }
 0x1e1   : > { %1488 = vst.msk [vmem:[%s3407_s12 + $0x88] sm:$0xff] %vm1470_vm3, %v1241_v46 }
 0x1e2   : > { %v2548_v47 = vpop.f32.mrf.mxu1 }
 0x1e4   : > { %v1246_v48 = vpop.f32.mrf.mxu1 }
 0x1e5   : > { %1489 = vst.msk [vmem:[%s3407_s12 + $0x90] sm:$0xff] %vm1470_vm3, %v1246_v48 }
 0x1e6   : > { %v2551_v49 = vpop.f32.mrf.mxu1 }
 0x1e8   : > { %v1251_v50 = vpop.f32.mrf.mxu1 }
 0x1e9   : > { %1490 = vst.msk [vmem:[%s3407_s12 + $0x98] sm:$0xff] %vm1470_vm3, %v1251_v50 }
 0x1ea   : > { %v2554_v51 = vpop.f32.mrf.mxu1 }
 0x1ec   : > { %v1256_v52 = vpop.f32.mrf.mxu1 }
 0x1ed   : > { %1491 = vst.msk [vmem:[%s3407_s12 + $0xa0] sm:$0xff] %vm1470_vm3, %v1256_v52 }
 0x1ee   : > { %v2557_v53 = vpop.f32.mrf.mxu1 }
 0x1f0   : > { %v1261_v54 = vpop.f32.mrf.mxu1 }
 0x1f1   : > { %1492 = vst.msk [vmem:[%s3407_s12 + $0xa8] sm:$0xff] %vm1470_vm3, %v1261_v54 }
 0x1f2   : > { %v2560_v55 = vpop.f32.mrf.mxu1 }
 0x1f4   : > { %v1266_v56 = vpop.f32.mrf.mxu1 }
 0x1f5   : > { %1493 = vst.msk [vmem:[%s3407_s12 + $0xb0] sm:$0xff] %vm1470_vm3, %v1266_v56 }
 0x1f6   : > { %v2563_v57 = vpop.f32.mrf.mxu1 }
 0x1f8   : > { %v1271_v58 = vpop.f32.mrf.mxu1 }
 0x1f9   : > { %1494 = vst.msk [vmem:[%s3407_s12 + $0xb8] sm:$0xff] %vm1470_vm3, %v1271_v58 }
 0x1fa   : > { %v2566_v59 = vpop.f32.mrf.mxu1 }
 0x1fc   : > { %v1276_v60 = vpop.f32.mrf.mxu1 }
 0x1fd   : > { %1495 = vst.msk [vmem:[%s3407_s12 + $0xc0] sm:$0xff] %vm1470_vm3, %v1276_v60 }
 0x1fe   : > { %v2569_v61 = vpop.f32.mrf.mxu1 }
 0x200   : > { %v1281_v63 = vpop.f32.mrf.mxu1 }
 0x201   : > { %1496 = vst.msk [vmem:[%s3407_s12 + $0xc8] sm:$0xff] %vm1470_vm3, %v1281_v63 }
 0x202   : > { %v2572_v0 = vpop.f32.mrf.mxu1 }
 0x204   : > { %v1286_v62 = vpop.f32.mrf.mxu1 }
 0x205   : > { %1497 = vst.msk [vmem:[%s3407_s12 + $0xd0] sm:$0xff] %vm1470_vm3, %v1286_v62 }
 0x206   : > { %v2575_v2 = vpop.f32.mrf.mxu1 }
 0x208   : > { %v1291_v3 = vpop.f32.mrf.mxu1 }
 0x209   : > { %1498 = vst.msk [vmem:[%s3407_s12 + $0xd8] sm:$0xff] %vm1470_vm3, %v1291_v3 }
 0x20a   : > { %v2578_v4 = vpop.f32.mrf.mxu1 }
 0x20c   : > { %v1296_v5 = vpop.f32.mrf.mxu1 }
 0x20d   : > { %1499 = vst.msk [vmem:[%s3407_s12 + $0xe0] sm:$0xff] %vm1470_vm3, %v1296_v5 }
 0x20e   : > { %v2581_v6 = vpop.f32.mrf.mxu1 }
 0x210   : > { %v1301_v7 = vpop.f32.mrf.mxu1 }
 0x211   : > { %1500 = vst.msk [vmem:[%s3407_s12 + $0xe8] sm:$0xff] %vm1470_vm3, %v1301_v7 }
 0x212   : > { %v2584_v8 = vpop.f32.mrf.mxu1 }
 0x214   : > { %v1306_v9 = vpop.f32.mrf.mxu1 }
 0x215   : > { %1501 = vst.msk [vmem:[%s3407_s12 + $0xf0] sm:$0xff] %vm1470_vm3, %v1306_v9 }
 0x216   : > { %v2587_v10 = vpop.f32.mrf.mxu1 }
 0x218   : > { %v1311_v11 = vpop.f32.mrf.mxu1 }
 0x219   : > { %1502 = vst.msk [vmem:[%s3407_s12 + $0xf8] sm:$0xff] %vm1470_vm3, %v1311_v11 }
 0x21a   : > { %v2590_v12 = vpop.f32.mrf.mxu1 }
 0x21c   : > { %v1316_v13 = vpop.f32.mrf.mxu1 }
 0x21d   : > { %1503 = vst.msk [vmem:[%s3407_s12 + $0x100] sm:$0xff] %vm1470_vm3, %v1316_v13 }
 0x21e   : > { %v2593_v14 = vpop.f32.mrf.mxu1 }
 0x220   : > { %v1321_v15 = vpop.f32.mrf.mxu1 }
 0x221   : > { %1504 = vst.msk [vmem:[%s3407_s12 + $0x108] sm:$0xff] %vm1470_vm3, %v1321_v15 }
 0x222   : > { %v2596_v16 = vpop.f32.mrf.mxu1 }
 0x224   : > { %v1326_v17 = vpop.f32.mrf.mxu1 }
 0x225   : > { %1505 = vst.msk [vmem:[%s3407_s12 + $0x110] sm:$0xff] %vm1470_vm3, %v1326_v17 }
 0x226   : > { %v2599_v18 = vpop.f32.mrf.mxu1 }
 0x228   : > { %v1331_v19 = vpop.f32.mrf.mxu1 }
 0x229   : > { %1506 = vst.msk [vmem:[%s3407_s12 + $0x118] sm:$0xff] %vm1470_vm3, %v1331_v19 }
 0x22a   : > { %v2602_v20 = vpop.f32.mrf.mxu1 }
 0x22c   : > { %v1336_v21 = vpop.f32.mrf.mxu1 }
 0x22d   : > { %1507 = vst.msk [vmem:[%s3407_s12 + $0x120] sm:$0xff] %vm1470_vm3, %v1336_v21 }
 0x22e   : > { %v2605_v22 = vpop.f32.mrf.mxu1 }
 0x230   : > { %v1341_v23 = vpop.f32.mrf.mxu1 }
 0x231   : > { %1508 = vst.msk [vmem:[%s3407_s12 + $0x128] sm:$0xff] %vm1470_vm3, %v1341_v23 }
 0x232   : > { %v2608_v24 = vpop.f32.mrf.mxu1 }
 0x234   : > { %v1346_v25 = vpop.f32.mrf.mxu1 }
 0x235   : > { %1509 = vst.msk [vmem:[%s3407_s12 + $0x130] sm:$0xff] %vm1470_vm3, %v1346_v25 }
 0x236   : > { %v2611_v26 = vpop.f32.mrf.mxu1 }
 0x238   : > { %v1351_v27 = vpop.f32.mrf.mxu1 }
 0x239   : > { %1510 = vst.msk [vmem:[%s3407_s12 + $0x138] sm:$0xff] %vm1470_vm3, %v1351_v27 }
 0x23a   : > { %v2614_v28 = vpop.f32.mrf.mxu1 }
 0x23c   : > { %v1356_v29 = vpop.f32.mrf.mxu1 }
 0x23d   : > { %1511 = vst.msk [vmem:[%s3407_s12 + $0x140] sm:$0xff] %vm1470_vm3, %v1356_v29 }
 0x23e   : > { %v2617_v30 = vpop.f32.mrf.mxu1 }
 0x240   : > { %v1361_v31 = vpop.f32.mrf.mxu1 }
 0x241   : > { %1512 = vst.msk [vmem:[%s3407_s12 + $0x148] sm:$0xff] %vm1470_vm3, %v1361_v31 }
 0x242   : > { %v2620_v32 = vpop.f32.mrf.mxu1 }
 0x244   : > { %v1366_v33 = vpop.f32.mrf.mxu1 }
 0x245   : > { %1513 = vst.msk [vmem:[%s3407_s12 + $0x150] sm:$0xff] %vm1470_vm3, %v1366_v33 }
 0x246   : > { %v2623_v34 = vpop.f32.mrf.mxu1 }
 0x248   : > { %v1371_v35 = vpop.f32.mrf.mxu1 }
 0x249   : > { %1514 = vst.msk [vmem:[%s3407_s12 + $0x158] sm:$0xff] %vm1470_vm3, %v1371_v35 }
 0x24a   : > { %v2626_v36 = vpop.f32.mrf.mxu1 }
 0x24c   : > { %v1376_v37 = vpop.f32.mrf.mxu1 }
 0x24d   : > { %1515 = vst.msk [vmem:[%s3407_s12 + $0x160] sm:$0xff] %vm1470_vm3, %v1376_v37 }
 0x24e   : > { %v2629_v38 = vpop.f32.mrf.mxu1 }
 0x250   : > { %v1381_v39 = vpop.f32.mrf.mxu1 }
 0x251   : > { %1516 = vst.msk [vmem:[%s3407_s12 + $0x168] sm:$0xff] %vm1470_vm3, %v1381_v39 }
 0x252   : > { %v2632_v40 = vpop.f32.mrf.mxu1 }
 0x254   : > { %v1386_v41 = vpop.f32.mrf.mxu1 }
 0x255   : > { %1517 = vst.msk [vmem:[%s3407_s12 + $0x170] sm:$0xff] %vm1470_vm3, %v1386_v41 }
 0x256   : > { %v2635_v42 = vpop.f32.mrf.mxu1 }
 0x258   : > { %v1391_v43 = vpop.f32.mrf.mxu1 }
 0x259   : > { %1518 = vst.msk [vmem:[%s3407_s12 + $0x178] sm:$0xff] %vm1470_vm3, %v1391_v43 }
 0x25a   : > { %v2638_v1 = vpop.f32.mrf.mxu1 }
 0x25c   : > { %v1396_v44 = vpop.f32.mrf.mxu1 }
 0x25d   : > { %1519 = vst.msk [vmem:[%s3407_s12 + $0x180] sm:$0xff] %vm1470_vm3, %v1396_v44 }
 0x25e   : > { %v2641_v45 = vpop.f32.mrf.mxu1 }
 0x260   : > { %v1401_v46 = vpop.f32.mrf.mxu1 }
 0x261   : > { %1520 = vst.msk [vmem:[%s3407_s12 + $0x188] sm:$0xff] %vm1470_vm3, %v1401_v46 }
 0x262   : > { %v2644_v47 = vpop.f32.mrf.mxu1 }
 0x264   : > { %v1406_v48 = vpop.f32.mrf.mxu1 }
 0x265   : > { %1521 = vst.msk [vmem:[%s3407_s12 + $0x190] sm:$0xff] %vm1470_vm3, %v1406_v48 }
 0x266   : > { %v2647_v49 = vpop.f32.mrf.mxu1 }
 0x268   : > { %v1411_v50 = vpop.f32.mrf.mxu1 }
 0x269   : > { %1522 = vst.msk [vmem:[%s3407_s12 + $0x198] sm:$0xff] %vm1470_vm3, %v1411_v50 }
 0x26a   : > { %v2650_v51 = vpop.f32.mrf.mxu1 }
 0x26c   : > { %v1416_v52 = vpop.f32.mrf.mxu1 }
 0x26d   : > { %1523 = vst.msk [vmem:[%s3407_s12 + $0x1a0] sm:$0xff] %vm1470_vm3, %v1416_v52 }
 0x26e   : > { %v2653_v53 = vpop.f32.mrf.mxu1 }
 0x270   : > { %v1421_v54 = vpop.f32.mrf.mxu1 }
 0x271   : > { %1524 = vst.msk [vmem:[%s3407_s12 + $0x1a8] sm:$0xff] %vm1470_vm3, %v1421_v54 }
 0x272   : > { %v2656_v55 = vpop.f32.mrf.mxu1 }
 0x274   : > { %v1426_v56 = vpop.f32.mrf.mxu1 }
 0x275   : > { %1525 = vst.msk [vmem:[%s3407_s12 + $0x1b0] sm:$0xff] %vm1470_vm3, %v1426_v56 }
 0x276   : > { %v2659_v57 = vpop.f32.mrf.mxu1 }
 0x278   : > { %v1431_v58 = vpop.f32.mrf.mxu1 }
 0x279   : > { %1526 = vst.msk [vmem:[%s3407_s12 + $0x1b8] sm:$0xff] %vm1470_vm3, %v1431_v58 }
 0x27a   : > { %v2662_v59 = vpop.f32.mrf.mxu1 }
 0x27c   : > { %v1436_v60 = vpop.f32.mrf.mxu1 }
 0x27d   : > { %1527 = vst.msk [vmem:[%s3407_s12 + $0x1c0] sm:$0xff] %vm1470_vm3, %v1436_v60 }
 0x27e   : > { %v2665_v61 = vpop.f32.mrf.mxu1 }
 0x280   : > { %v1441_v63 = vpop.f32.mrf.mxu1 }
 0x281   : > { %1528 = vst.msk [vmem:[%s3407_s12 + $0x1c8] sm:$0xff] %vm1470_vm3, %v1441_v63 }
 0x282   : > { %v2668_v0 = vpop.f32.mrf.mxu1 }
 0x284   : > { %v1446_v62 = vpop.f32.mrf.mxu1 }
 0x285   : > { %1529 = vst.msk [vmem:[%s3407_s12 + $0x1d0] sm:$0xff] %vm1470_vm3, %v1446_v62 }
 0x286   : > { %v2671_v2 = vpop.f32.mrf.mxu1 }
 0x288   : > { %v1451_v3 = vpop.f32.mrf.mxu1 }
 0x289   : > { %1530 = vst.msk [vmem:[%s3407_s12 + $0x1d8] sm:$0xff] %vm1470_vm3, %v1451_v3 }
 0x28a   : > { %v2674_v4 = vpop.f32.mrf.mxu1 }
 0x28c   : > { %v1456_v5 = vpop.f32.mrf.mxu1 }
 0x28d   : > { %1531 = vst.msk [vmem:[%s3407_s12 + $0x1e0] sm:$0xff] %vm1470_vm3, %v1456_v5 }
 0x28e   : > { %v2677_v6 = vpop.f32.mrf.mxu1 }
 0x290   : > { %v1461_v7 = vpop.f32.mrf.mxu1 }
 0x291   : > { %1532 = vst.msk [vmem:[%s3407_s12 + $0x1e8] sm:$0xff] %vm1470_vm3, %v1461_v7 }
 0x292   : > { %v2680_v8 = vpop.f32.mrf.mxu1  ;;  %1540 = sbr.rel (!%p2931_p4) target bundleno = 741 (0x2e5), region = 36 }
 0x294   : > { %v1466_v9 = vpop.f32.mrf.mxu1 }
 0x295   : > { %1533 = vst.msk [vmem:[%s3407_s12 + $0x1f0] sm:$0xff] %vm1470_vm3, %v1466_v9 }
 0x296   : > { %v2683_v10 = vpop.f32.mrf.mxu1 }
 0x297   : > { %s3787_s6 = smov (!%p1543_p8, %s1542_s6), 63 }
 0x298   : > { %s2131_s11 = sshll.u32 %s3787_s6, 7 }
 0x299   : > { %p2134_p9 = scmp.eq.s32.totalorder %s2131_s11, 0 }
 0x29a   : > { %2792 = sdivrem.u32 (!%p2134_p9), %s3787_s6, 63 }
 0x29b   : > { %1551 = sbr.rel (%p2134_p9) target bundleno = 741 (0x2e5), region = 40 }
 0x2a3   : > { %s3587_s20 = spop.drf %2792 }
 0x2a4   : > { %p2135_p10 = scmp.le.s32.totalorder %s3587_s20, 0 }
 0x2a5   : > { %s3778_s15 = smov (!%p2135_p10), %s3581_s10  ;;  %s3779_s23 = smov (!%p2135_p10), %s3407_s12 }
 0x2a6   : > { %1956 = sbr.rel (%p2135_p10) target bundleno = 716 (0x2cc), region = 116  ;;  %s3596_s14 = smov (!%p2135_p10), 0  }
 0x2a7   : > { %s3598_s17 = smov (!%p2135_p10), 0  }
 0x2ab LB: >> { %v1740_v11 = vld [vmem:[%s2858_s23] sm:$0xff]  ;;  %v1742_v12 = vld [vmem:[%s2858_s23 + $0x8] sm:$0xff]  ;;  %v1744_v13 = vld [vmem:[%s2858_s23 + $0x10] sm:$0xff]  ;;  %s1866_s18 = sadd.s32 1, %s2862_s14  ;;  %s1734_s17 = sadd.s32 1, %s2866_s17   ;;  %s2866_s17 = sphi %s3598_s17, %s1734_s17   ;;  %s2862_s14 = sphi %s3596_s14, %s3782_s14   ;;  %s2858_s23 = sphi %s3779_s23, %s3781_s23   ;;  %s2854_s15 = sphi %s3778_s15, %s3780_s15  }
 0x2ac   : >> { %1741 = vst [vmem:[%s2854_s15] sm:$0xff] %v1740_v11  ;;  %1743 = vst [vmem:[%s2854_s15 + $0x8] sm:$0xff] %v1742_v12  ;;  %v1746_v14 = vld [vmem:[%s2858_s23 + $0x18] sm:$0xff]  ;;  %v1748_v15 = vld [vmem:[%s2858_s23 + $0x20] sm:$0xff]  ;;  %p1867_p11 = scmp.ge.s32.totalorder %s1866_s18, %s3587_s20  ;;  %p1733_p12 = scmp.ge.s32.totalorder %s1734_s17, %s3587_s20 }
 0x2ad   : >> { %1745 = vst [vmem:[%s2854_s15 + $0x10] sm:$0xff] %v1744_v13  ;;  %v1750_v16 = vld [vmem:[%s2858_s23 + $0x28] sm:$0xff]  ;;  %1747 = vst [vmem:[%s2854_s15 + $0x18] sm:$0xff] %v1746_v14  ;;  %v1752_v17 = vld [vmem:[%s2858_s23 + $0x30] sm:$0xff] }
 0x2ae   : >> { %1749 = vst [vmem:[%s2854_s15 + $0x20] sm:$0xff] %v1748_v15  ;;  %1751 = vst [vmem:[%s2854_s15 + $0x28] sm:$0xff] %v1750_v16  ;;  %v1754_v18 = vld [vmem:[%s2858_s23 + $0x38] sm:$0xff]  ;;  %v1756_v19 = vld [vmem:[%s2858_s23 + $0x40] sm:$0xff]  ;;  %s3789_s18 = smov (%p1867_p11, %s1866_s18), 0 }
 0x2af   : >> { %1753 = vst [vmem:[%s2854_s15 + $0x30] sm:$0xff] %v1752_v17  ;;  %1755 = vst [vmem:[%s2854_s15 + $0x38] sm:$0xff] %v1754_v18  ;;  %v1758_v20 = vld [vmem:[%s2858_s23 + $0x48] sm:$0xff]  ;;  %v1760_v21 = vld [vmem:[%s2858_s23 + $0x50] sm:$0xff]  ;;  %s1869_s21 = smul.u32 504, %s3789_s18  ;;  %s3782_s14 = smov %s3789_s18 }
 0x2b0   : >> { %1757 = vst [vmem:[%s2854_s15 + $0x40] sm:$0xff] %v1756_v19  ;;  %v1762_v22 = vld [vmem:[%s2858_s23 + $0x58] sm:$0xff]  ;;  %1759 = vst [vmem:[%s2854_s15 + $0x48] sm:$0xff] %v1758_v20  ;;  %v1764_v23 = vld [vmem:[%s2858_s23 + $0x60] sm:$0xff] }
 0x2b1   : >> { %1761 = vst [vmem:[%s2854_s15 + $0x50] sm:$0xff] %v1760_v21  ;;  %1763 = vst [vmem:[%s2854_s15 + $0x58] sm:$0xff] %v1762_v22  ;;  %v1766_v24 = vld [vmem:[%s2858_s23 + $0x68] sm:$0xff]  ;;  %v1768_v25 = vld [vmem:[%s2858_s23 + $0x70] sm:$0xff]  ;;  %s3660_s22 = scalar_lea.vmem %s3407_s12, %s1869_s21 [#allocation2]   ;;  %s3663_s24 = scalar_lea.vmem %s3581_s10, %s1869_s21  }
 0x2b2   : >> { %1765 = vst [vmem:[%s2854_s15 + $0x60] sm:$0xff] %v1764_v23  ;;  %1767 = vst [vmem:[%s2854_s15 + $0x68] sm:$0xff] %v1766_v24  ;;  %v1770_v26 = vld [vmem:[%s2858_s23 + $0x78] sm:$0xff]  ;;  %v1772_v27 = vld [vmem:[%s2858_s23 + $0x80] sm:$0xff] }
 0x2b3   : >> { %1769 = vst [vmem:[%s2854_s15 + $0x70] sm:$0xff] %v1768_v25  ;;  %v1774_v28 = vld [vmem:[%s2858_s23 + $0x88] sm:$0xff]  ;;  %1771 = vst [vmem:[%s2854_s15 + $0x78] sm:$0xff] %v1770_v26  ;;  %v1776_v29 = vld [vmem:[%s2858_s23 + $0x90] sm:$0xff] }
 0x2b4   : >> { %1773 = vst [vmem:[%s2854_s15 + $0x80] sm:$0xff] %v1772_v27  ;;  %1775 = vst [vmem:[%s2854_s15 + $0x88] sm:$0xff] %v1774_v28  ;;  %v1778_v30 = vld [vmem:[%s2858_s23 + $0x98] sm:$0xff]  ;;  %v1780_v31 = vld [vmem:[%s2858_s23 + $0xa0] sm:$0xff] }
 0x2b5   : >> { %1777 = vst [vmem:[%s2854_s15 + $0x90] sm:$0xff] %v1776_v29  ;;  %1779 = vst [vmem:[%s2854_s15 + $0x98] sm:$0xff] %v1778_v30  ;;  %v1782_v32 = vld [vmem:[%s2858_s23 + $0xa8] sm:$0xff]  ;;  %v1784_v33 = vld [vmem:[%s2858_s23 + $0xb0] sm:$0xff] }
 0x2b6   : >> { %1781 = vst [vmem:[%s2854_s15 + $0xa0] sm:$0xff] %v1780_v31  ;;  %v1786_v34 = vld [vmem:[%s2858_s23 + $0xb8] sm:$0xff]  ;;  %1783 = vst [vmem:[%s2854_s15 + $0xa8] sm:$0xff] %v1782_v32  ;;  %v1788_v35 = vld [vmem:[%s2858_s23 + $0xc0] sm:$0xff] }
 0x2b7   : >> { %1785 = vst [vmem:[%s2854_s15 + $0xb0] sm:$0xff] %v1784_v33  ;;  %1787 = vst [vmem:[%s2854_s15 + $0xb8] sm:$0xff] %v1786_v34  ;;  %v1790_v36 = vld [vmem:[%s2858_s23 + $0xc8] sm:$0xff]  ;;  %v1792_v37 = vld [vmem:[%s2858_s23 + $0xd0] sm:$0xff] }
 0x2b8   : >> { %1789 = vst [vmem:[%s2854_s15 + $0xc0] sm:$0xff] %v1788_v35  ;;  %1791 = vst [vmem:[%s2854_s15 + $0xc8] sm:$0xff] %v1790_v36  ;;  %v1794_v38 = vld [vmem:[%s2858_s23 + $0xd8] sm:$0xff]  ;;  %v1796_v39 = vld [vmem:[%s2858_s23 + $0xe0] sm:$0xff] }
 0x2b9   : >> { %1793 = vst [vmem:[%s2854_s15 + $0xd0] sm:$0xff] %v1792_v37  ;;  %v1798_v40 = vld [vmem:[%s2858_s23 + $0xe8] sm:$0xff]  ;;  %1795 = vst [vmem:[%s2854_s15 + $0xd8] sm:$0xff] %v1794_v38  ;;  %v1800_v41 = vld [vmem:[%s2858_s23 + $0xf0] sm:$0xff] }
 0x2ba   : >> { %1797 = vst [vmem:[%s2854_s15 + $0xe0] sm:$0xff] %v1796_v39  ;;  %1799 = vst [vmem:[%s2854_s15 + $0xe8] sm:$0xff] %v1798_v40  ;;  %v1802_v42 = vld [vmem:[%s2858_s23 + $0xf8] sm:$0xff]  ;;  %v1804_v43 = vld [vmem:[%s2858_s23 + $0x100] sm:$0xff] }
 0x2bb   : >> { %1801 = vst [vmem:[%s2854_s15 + $0xf0] sm:$0xff] %v1800_v41  ;;  %1803 = vst [vmem:[%s2854_s15 + $0xf8] sm:$0xff] %v1802_v42  ;;  %v1806_v1 = vld [vmem:[%s2858_s23 + $0x108] sm:$0xff]  ;;  %v1808_v44 = vld [vmem:[%s2858_s23 + $0x110] sm:$0xff] }
 0x2bc   : >> { %1805 = vst [vmem:[%s2854_s15 + $0x100] sm:$0xff] %v1804_v43  ;;  %v1810_v45 = vld [vmem:[%s2858_s23 + $0x118] sm:$0xff]  ;;  %1807 = vst [vmem:[%s2854_s15 + $0x108] sm:$0xff] %v1806_v1  ;;  %v1812_v46 = vld [vmem:[%s2858_s23 + $0x120] sm:$0xff] }
 0x2bd   : >> { %1809 = vst [vmem:[%s2854_s15 + $0x110] sm:$0xff] %v1808_v44  ;;  %1811 = vst [vmem:[%s2854_s15 + $0x118] sm:$0xff] %v1810_v45  ;;  %v1814_v47 = vld [vmem:[%s2858_s23 + $0x128] sm:$0xff]  ;;  %v1816_v48 = vld [vmem:[%s2858_s23 + $0x130] sm:$0xff] }
 0x2be   : >> { %1813 = vst [vmem:[%s2854_s15 + $0x120] sm:$0xff] %v1812_v46  ;;  %1815 = vst [vmem:[%s2854_s15 + $0x128] sm:$0xff] %v1814_v47  ;;  %v1818_v49 = vld [vmem:[%s2858_s23 + $0x138] sm:$0xff]  ;;  %v1820_v50 = vld [vmem:[%s2858_s23 + $0x140] sm:$0xff] }
 0x2bf   : >> { %1817 = vst [vmem:[%s2854_s15 + $0x130] sm:$0xff] %v1816_v48  ;;  %v1822_v51 = vld [vmem:[%s2858_s23 + $0x148] sm:$0xff]  ;;  %1819 = vst [vmem:[%s2854_s15 + $0x138] sm:$0xff] %v1818_v49  ;;  %v1824_v52 = vld [vmem:[%s2858_s23 + $0x150] sm:$0xff] }
 0x2c0   : >> { %1821 = vst [vmem:[%s2854_s15 + $0x140] sm:$0xff] %v1820_v50  ;;  %1823 = vst [vmem:[%s2854_s15 + $0x148] sm:$0xff] %v1822_v51  ;;  %v1826_v53 = vld [vmem:[%s2858_s23 + $0x158] sm:$0xff]  ;;  %v1828_v54 = vld [vmem:[%s2858_s23 + $0x160] sm:$0xff] }
 0x2c1   : >> { %1825 = vst [vmem:[%s2854_s15 + $0x150] sm:$0xff] %v1824_v52  ;;  %1827 = vst [vmem:[%s2854_s15 + $0x158] sm:$0xff] %v1826_v53  ;;  %v1830_v55 = vld [vmem:[%s2858_s23 + $0x168] sm:$0xff]  ;;  %v1832_v56 = vld [vmem:[%s2858_s23 + $0x170] sm:$0xff] }
 0x2c2   : >> { %1829 = vst [vmem:[%s2854_s15 + $0x160] sm:$0xff] %v1828_v54  ;;  %v1834_v57 = vld [vmem:[%s2858_s23 + $0x178] sm:$0xff]  ;;  %1831 = vst [vmem:[%s2854_s15 + $0x168] sm:$0xff] %v1830_v55  ;;  %v1836_v58 = vld [vmem:[%s2858_s23 + $0x180] sm:$0xff] }
 0x2c3   : >> { %1833 = vst [vmem:[%s2854_s15 + $0x170] sm:$0xff] %v1832_v56  ;;  %1835 = vst [vmem:[%s2854_s15 + $0x178] sm:$0xff] %v1834_v57  ;;  %v1838_v59 = vld [vmem:[%s2858_s23 + $0x188] sm:$0xff]  ;;  %v1840_v60 = vld [vmem:[%s2858_s23 + $0x190] sm:$0xff] }
 0x2c4   : >> { %1837 = vst [vmem:[%s2854_s15 + $0x180] sm:$0xff] %v1836_v58  ;;  %1839 = vst [vmem:[%s2854_s15 + $0x188] sm:$0xff] %v1838_v59  ;;  %v1842_v61 = vld [vmem:[%s2858_s23 + $0x198] sm:$0xff]  ;;  %v1844_v63 = vld [vmem:[%s2858_s23 + $0x1a0] sm:$0xff] }
 0x2c5   : >> { %1841 = vst [vmem:[%s2854_s15 + $0x190] sm:$0xff] %v1840_v60  ;;  %v1846_v0 = vld [vmem:[%s2858_s23 + $0x1a8] sm:$0xff]  ;;  %1843 = vst [vmem:[%s2854_s15 + $0x198] sm:$0xff] %v1842_v61  ;;  %v1848_v62 = vld [vmem:[%s2858_s23 + $0x1b0] sm:$0xff] }
 0x2c6   : >> { %1845 = vst [vmem:[%s2854_s15 + $0x1a0] sm:$0xff] %v1844_v63  ;;  %1847 = vst [vmem:[%s2854_s15 + $0x1a8] sm:$0xff] %v1846_v0  ;;  %v1850_v2 = vld [vmem:[%s2858_s23 + $0x1b8] sm:$0xff]  ;;  %v1852_v3 = vld [vmem:[%s2858_s23 + $0x1c0] sm:$0xff] }
 0x2c7   : >> { %1849 = vst [vmem:[%s2854_s15 + $0x1b0] sm:$0xff] %v1848_v62  ;;  %1851 = vst [vmem:[%s2854_s15 + $0x1b8] sm:$0xff] %v1850_v2  ;;  %v1854_v4 = vld [vmem:[%s2858_s23 + $0x1c8] sm:$0xff]  ;;  %v1856_v5 = vld [vmem:[%s2858_s23 + $0x1d0] sm:$0xff]  ;;  %1736 = sbr.rel (!%p1733_p12) target bundleno = 683 (0x2ab), region = 122 }
 0x2c8   : >> { %1853 = vst [vmem:[%s2854_s15 + $0x1c0] sm:$0xff] %v1852_v3  ;;  %v1858_v6 = vld [vmem:[%s2858_s23 + $0x1d8] sm:$0xff]  ;;  %1855 = vst [vmem:[%s2854_s15 + $0x1c8] sm:$0xff] %v1854_v4  ;;  %v1860_v7 = vld [vmem:[%s2858_s23 + $0x1e0] sm:$0xff] }
 0x2c9   : >> { %1857 = vst [vmem:[%s2854_s15 + $0x1d0] sm:$0xff] %v1856_v5  ;;  %1859 = vst [vmem:[%s2854_s15 + $0x1d8] sm:$0xff] %v1858_v6  ;;  %v1862_v8 = vld [vmem:[%s2858_s23 + $0x1e8] sm:$0xff]  ;;  %v1864_v9 = vld [vmem:[%s2858_s23 + $0x1f0] sm:$0xff]  ;;  %s3781_s23 = smov %s3660_s22 }
 0x2ca   : >> { %1861 = vst [vmem:[%s2854_s15 + $0x1e0] sm:$0xff] %v1860_v7  ;;  %1863 = vst [vmem:[%s2854_s15 + $0x1e8] sm:$0xff] %v1862_v8 }
 0x2cb   : >> { %1865 = vst [vmem:[%s2854_s15 + $0x1f0] sm:$0xff] %v1864_v9  ;;  %s3780_s15 = smov %s3663_s24 }
 0x2cc PF: > { %2794 = sdivrem.u32 %s3787_s6, 63 }
 0x2cd   : > { %s2136_s25 = smul.u32 504, %s3587_s20 }
 0x2cf   : > { %s1877_s26 = scalar_lea.vmem %s3407_s12, %s2136_s25 [#allocation2]   ;;  %s1879_s27 = scalar_lea.vmem %s3581_s10, %s2136_s25  }
 0x2d5   : > { %s2795_s28 = spop.drf %2794 }
 0x2d6   : > { %p2138_p13 = scmp.le.s32.totalorder %s2795_s28, 0 }
 0x2d7   : > { %s2868_s29 = smov (!%p2138_p13), %s1879_s27   ;;  %s2872_s30 = smov (!%p2138_p13), %s1877_s26  }
 0x2d8   : > { %1970 = sbr.rel (%p2138_p13) target bundleno = 741 (0x2e5), region = 127  ;;  %s2876_s4 = smov (!%p2138_p13), 0  }
 0x2d9   : > { %s2880_s5 = smov (!%p2138_p13), 0  }
 0x2dd LB: >> { %v1889_v10 = vld [vmem:[%s2874_s30] sm:$0xff]  ;;  %s1891_s7 = sadd.s32 1, %s2878_s4  ;;  %s1883_s5 = sadd.s32 1, %s2882_s5   ;;  %s2882_s5 = sphi %s2880_s5, %s1883_s5   ;;  %s2878_s4 = sphi %s2876_s4, %s2877_s4   ;;  %s2874_s30 = sphi %s2872_s30, %s1896_s30   ;;  %s2870_s29 = sphi %s2868_s29, %s1897_s29  }
 0x2de   : >> { %1890 = vst [vmem:[%s2870_s29] sm:$0xff] %v1889_v10  ;;  %p1892_p0 = scmp.ge.s32.totalorder %s1891_s7, %s2795_s28  ;;  %p1882_p1 = scmp.ge.s32.totalorder %s1883_s5, %s2795_s28 }
 0x2e0   : >> { %s3791_s7 = smov (%p1892_p0, %s1891_s7), 0  ;;  %1885 = sbr.rel (!%p1882_p1) target bundleno = 733 (0x2dd), region = 133 }
 0x2e1   : >> { %s2139_s12 = sshll.u32 %s3791_s7, 3  ;;  %s2877_s4 = smov %s3791_s7  }
 0x2e2   : >> { %s1896_s30 = scalar_lea.vmem %s1877_s26, %s2139_s12 [#allocation2]   ;;  %s1897_s29 = scalar_lea.vmem %s1879_s27, %s2139_s12  }
 0x2e5 PF: > { %p10_p2 = scmp.ge.s32.totalorder %s2921_s16, 4   ;;  %s3783_s12 = smov %s2846_s13 }
 0x2e6   : > { %s3784_s13 = smov %s2929_s19  ;;  %s3785_s14 = smov %s2921_s16 }
 0x2e7   :  { %12 = sbr.rel (!%p10_p2) target bundleno = 2 (0x2), region = 144 }

</bundles_post_ra>
